<compile_context>
chip_gen: v7x
topology: tpu7x:2x2x1
jax: 0.10.0
libtpu: 0.0.40
codegen_flags: <defaults>
</compile_context>

<pallas_src>
import math
from functools import partial
from types import SimpleNamespace

import jax
import jax.numpy as jnp
from jax import lax
from jax.experimental import pallas as pl
from jax.experimental.pallas import tpu as pltpu


def _round_up(x, m):
    return ((x + m - 1) // m) * m


# --------------------------- Buffered(1) capability probe --------------------------

_SINGLE_BUFFER_WEIGHTS = None


def _weights_single_buffer_ok():
    """Probe once whether pipeline_mode=pl.Buffered(1) works for constant blocks."""
    global _SINGLE_BUFFER_WEIGHTS
    if _SINGLE_BUFFER_WEIGHTS is None:
        try:
            def _probe(w_ref, o_ref):
                o_ref[...] = w_ref[...] + 1.0

            spec = pl.BlockSpec((8, 128), lambda i: (0, 0),
                                pipeline_mode=pl.Buffered(1))
            x = jnp.ones((8, 128), jnp.float32)
            out = pl.pallas_call(
                _probe,
                out_shape=jax.ShapeDtypeStruct((8, 128), jnp.float32),
                grid=(2,),
                in_specs=[spec],
                out_specs=pl.BlockSpec((8, 128), lambda i: (0, 0)),
            )(x)
            jax.block_until_ready(out)
            _SINGLE_BUFFER_WEIGHTS = bool(jnp.all(out == 2.0))
        except Exception:
            _SINGLE_BUFFER_WEIGHTS = False
    return _SINGLE_BUFFER_WEIGHTS


# --------------------------- fused ResBlock kernel ---------------------------------

def _resblock_kernel(*refs, conv_meta, halo, slope, scale, has_acc, T_live, T_tile):
    """Fused ResBlock:  for each pair  x <- x + conv_d2(lrelu(conv_d1(lrelu(x)))),
    then (optionally) add the running MRF accumulator and scale by 1/n_resblocks.

    refs = [x_left_halo, x_center, x_right_halo, (acc)?, (w,b) per conv ..., out]
    conv_meta = ((K1, d1, pad1), (K2, d2, pad2)) per pair.
    """
    xl_ref, xc_ref, xr_ref = refs[0], refs[1], refs[2]
    idx = 3
    acc_ref = None
    if has_acc:
        acc_ref = refs[idx]
        idx += 1
    o_ref = refs[-1]
    wb_refs = refs[idx:-1]
    assert len(wb_refs) == 4 * len(conv_meta)

    h_blk = xl_ref.shape[1]
    i = pl.program_id(0)                      # time-tile index (grid = (nt, N))
    t0 = i * T_tile                           # live-time coordinate of output row 0

    # Assemble the haloed window in f32. The bf16 input buffer has explicit zero
    # margins / tail rows, so the zeros double as the convs' 'same' padding and no
    # input-edge mask is needed.
    xl = xl_ref[0]
    xc = xc_ref[0]
    xr = xr_ref[0]
    if halo > 0:
        x_win = jnp.concatenate(
            [xl[h_blk - halo:].astype(jnp.float32),
             xc.astype(jnp.float32),
             xr[:halo].astype(jnp.float32)], axis=0)          # (T_tile + 2*halo, C)
    else:
        x_win = xc.astype(jnp.float32)

    def dilated_conv(a_bf16, w_ref, b_ref, dil, n_out):
        # K accumulated (n_out, C)@(C, C) MXU dots, f32 accumulation.
        s = None
        K = w_ref.shape[0]
        for k in range(K):
            part = jnp.dot(a_bf16[k * dil:k * dil + n_out, :], w_ref[k],
                           preferred_element_type=jnp.float32)
            s = part if s is None else s + part
        return s + b_ref[...]

    rem = halo                                # halo rows still carried by x_win
    n_pairs = len(conv_meta)
    for p_idx, ((K1, d1, pad1), (K2, d2, pad2)) in enumerate(conv_meta):
        w1, b1, w2, b2 = wb_refs[4 * p_idx:4 * p_idx + 4]

        # ---- leaky_relu -> dilated conv 1 ----
        a1 = jnp.where(x_win >= 0, x_win, x_win * slope).astype(jnp.bfloat16)
        rem1 = rem - pad1
        n1 = T_tile + 2 * rem1
        y1 = dilated_conv(a1, w1, b1, d1, n1)                  # (n1, C) f32
        # conv2's 'same' zero padding: zero rows outside the live range [0, T_live)
        rows1 = (t0 - rem1) + lax.broadcasted_iota(jnp.int32, (n1, 1), 0)
        y1 = jnp.where((rows1 >= 0) & (rows1 < T_live), y1, 0.0)

        # ---- leaky_relu -> dilated conv 2 ----
        a2 = jnp.where(y1 >= 0, y1, y1 * slope).astype(jnp.bfloat16)
        rem2 = rem1 - pad2
        n2 = T_tile + 2 * rem2
        y2 = dilated_conv(a2, w2, b2, d2, n2)                  # (n2, C) f32

        # ---- residual add on the shrunk window ----
        off = rem - rem2
        x_win = x_win[off:off + n2, :] + y2
        if p_idx + 1 < n_pairs:
            # next pair's conv needs zeros outside the live range again
            rows2 = (t0 - rem2) + lax.broadcasted_iota(jnp.int32, (n2, 1), 0)
            x_win = jnp.where((rows2 >= 0) & (rows2 < T_live), x_win, 0.0)
        rem = rem2

    out = x_win                               # (T_tile, C) f32; rem == 0 by design
    if has_acc:
        out = out + acc_ref[0].astype(jnp.float32)
    if scale != 1.0:
        out = out * scale
    o_ref[0] = out.astype(o_ref.dtype)


def _prep_conv_params(w, b, C_pad):
    """PyTorch (C_out, C_in, K) weight -> (K, C_pad, C_pad) bf16 + (1, C_pad) f32 bias."""
    C_out, C_in, K = w.shape
    w_kio = jnp.transpose(w, (2, 1, 0))                        # (K, C_in, C_out)
    wp = jnp.zeros((K, C_pad, C_pad), jnp.float32).at[:, :C_in, :C_out].set(w_kio)
    bp = jnp.zeros((1, C_pad), jnp.float32).at[0, :C_out].set(b)
    return wp.astype(jnp.bfloat16), bp


def _fused_resblock(x_buf, block, *, acc, scale, slope, T_live, T_tile):
    """One pallas_call computing a full ResBlock (plus optional MRF-acc add / scaling).

    x_buf / acc / output share the padded bf16 layout (N, T_tile + T_round + T_tile,
    C_pad) with the live samples at rows [T_tile, T_tile + T_live).
    """
    N, T_buf, C_pad = x_buf.shape
    nt = (T_buf - 2 * T_tile) // T_tile
    assert nt * T_tile + 2 * T_tile == T_buf

    conv_meta = []
    wb_args = []
    for pair in block:
        metas = []
        for (w, b, d) in pair:
            K = w.shape[-1]
            assert K % 2 == 1, "HiFi-GAN 'same' padding assumes an odd kernel size"
            metas.append((K, d, (K * d - d) // 2))
            wf, bf = _prep_conv_params(w, b, C_pad)
            wb_args += [wf, bf]
        conv_meta.append(tuple(metas))
    conv_meta = tuple(conv_meta)

    halo = sum(p for pair in conv_meta for (_, _, p) in pair)
    assert halo <= T_tile, "time tile must cover the fused resblock halo"
    h_blk = max(8, pl.next_power_of_2(max(halo, 1)))           # power of two >= halo
    assert T_tile % h_blk == 0
    r = T_tile // h_blk

    kernel = partial(_resblock_kernel, conv_meta=conv_meta, halo=halo,
                     slope=float(slope), scale=float(scale),
                     has_acc=acc is not None, T_live=int(T_live), T_tile=int(T_tile))

    center = pl.BlockSpec((1, T_tile, C_pad), lambda i, n: (n, i + 1, 0))
    in_specs = [
        pl.BlockSpec((1, h_blk, C_pad), lambda i, n: (n, (i + 1) * r - 1, 0)),  # left halo
        center,                                                                  # center
        pl.BlockSpec((1, h_blk, C_pad), lambda i, n: (n, (i + 2) * r, 0)),       # right halo
    ]
    args = [x_buf, x_buf, x_buf]
    if acc is not None:
        in_specs.append(center)
        args.append(acc)

    single = _weights_single_buffer_ok()
    wkw = {"pipeline_mode": pl.Buffered(1)} if single else {}
    for arr in wb_args:
        imap = (lambda i, n: (0, 0, 0)) if arr.ndim == 3 else (lambda i, n: (0, 0))
        in_specs.append(pl.BlockSpec(arr.shape, imap, **wkw))
    args += wb_args

    # ---- advisory cost estimate ----
    flops = 0
    rem = halo
    for (K1, _, p1), (K2, _, p2) in conv_meta:
        rem -= p1
        flops += 2 * K1 * C_pad * C_pad * (T_tile + 2 * rem)
        rem -= p2
        flops += 2 * K2 * C_pad * C_pad * (T_tile + 2 * rem)
    flops *= N * nt
    w_bytes = sum(int(a.size) * a.dtype.itemsize for a in wb_args)
    act_blk = 2 * C_pad * T_tile                               # bf16 tile bytes
    tile_bytes = act_blk * (2 if acc is None else 3) + 2 * 2 * C_pad * h_blk
    cost = pl.CostEstimate(flops=int(flops), transcendentals=0,
                           bytes_accessed=int(tile_bytes * N * nt + w_bytes))

    # ---- VMEM budget: conservative on v7x (64 MiB), larger on v5e/v6e (128 MiB) ----
    try:
        vmem_cap = int(pltpu.get_tpu_info().vmem_capacity_bytes) * 3 // 4
    except Exception:
        vmem_cap = 48 * 2 ** 20
    bufs = (2 * (act_blk + 2 * 2 * C_pad * h_blk)              # x center + halos (x2 bufs)
            + 2 * act_blk                                      # output (x2 bufs)
            + (2 * act_blk if acc is not None else 0))         # acc (x2 bufs)
    wgt = w_bytes * (1 if single else 2)
    tmp = 12 * 4 * C_pad * (T_tile + 2 * halo)                 # generous f32 window temps
    vmem_limit = int(min(vmem_cap, max(32 * 2 ** 20, bufs + wgt + tmp)))

    return pl.pallas_call(
        kernel,
        out_shape=jax.ShapeDtypeStruct((N, T_buf, C_pad), x_buf.dtype),
        grid=(nt, N),                                          # time first: dual-TC for N=1
        in_specs=in_specs,
        out_specs=center,
        compiler_params=pltpu.CompilerParams(
            dimension_semantics=("parallel", "parallel"),
            vmem_limit_bytes=vmem_limit),
        cost_estimate=cost,
    )(*args)


# --------------------------- parameter construction (synthetic) --------------------

def init_params(key, train_config, in_channels):
    """Mirrors ResBlock/MRF __init__: weight ~ N(0, 0.01), bias ~ PyTorch default.

    weight_norm is a reparameterization that is the identity on the forward pass at
    initialization (g = ||v||), so plain weights are used directly.
    """
    params = []
    for ks in train_config.resblock_kernel_sizes:
        block = []
        for d1, d2 in train_config.D_r:
            pair = []
            for d in (d1, d2):
                key, kw, kb = jax.random.split(key, 3)
                w = 0.01 * jax.random.normal(
                    kw, (in_channels, in_channels, ks), jnp.float32)
                bound = 1.0 / math.sqrt(in_channels * ks)
                b = jax.random.uniform(kb, (in_channels,), jnp.float32, -bound, bound)
                pair.append((w, b, d))
            block.append(pair)
        params.append(block)
    return params


# --------------------------- MRF forward (Pallas hot path) -------------------------

def mrf_forward_pallas(x_ncl, params, slope):
    """x_ncl: (N, C, T) PyTorch layout. Returns (N, C, T) float32."""
    N, C, T = x_ncl.shape
    C_pad = _round_up(C, 128)

    # per-resblock halo = sum of the per-conv 'same' pads of that block
    block_halos = [sum((w.shape[-1] * d - d) // 2 for pair in block for (w, _, d) in pair)
                   for block in params]
    H_max = max(block_halos)

    # time tile: multiple of max(64, halo block) so the halo DMA stays a small fraction
    # of the tile; sized for ~1 MiB bf16 activation blocks.
    align = max(64, pl.next_power_of_2(max(H_max, 1)))
    tgt = max(align, min(2048, (1 << 20) // (C_pad * 2)))
    tgt = (tgt // align) * align
    n_tiles = max(1, -(-T // tgt))
    T_tile = _round_up(-(-T // n_tiles), align)
    T_round = _round_up(T, T_tile)
    T_buf = T_round + 2 * T_tile

    # persistent padded bf16 NTC buffer; live samples at rows [T_tile, T_tile + T);
    # explicit zero margins/tail double as the convs' 'same' zero padding.
    x_ntc = jnp.transpose(x_ncl, (0, 2, 1))
    buf0 = jnp.zeros((N, T_buf, C_pad), jnp.bfloat16)
    buf0 = buf0.at[:, T_tile:T_tile + T, :C].set(x_ntc.astype(jnp.bfloat16))

    acc = None
    nb = len(params)
    for bi, block in enumerate(params):
        # TODO(synk): for small C (<=256) all resblocks could be fused into a single
        # call (buf0 read once); kept per-resblock so folded weights fit v7x VMEM.
        acc = _fused_resblock(
            buf0, block, acc=acc,
            scale=(1.0 / nb) if bi == nb - 1 else 1.0,
            slope=slope, T_live=T, T_tile=T_tile)

    out_ntc = acc[:, T_tile:T_tile + T, :C].astype(jnp.float32)
    return jnp.transpose(out_ntc, (0, 2, 1))


# --------------------------- pure-JAX reference (correctness) ----------------------

def conv1d_lrelu_ref(x_ntc, weight, bias, dilation, slope):
    x = jnp.where(x_ntc >= 0, x_ntc, slope * x_ntc)
    x_nct = jnp.transpose(x, (0, 2, 1))
    K = weight.shape[-1]
    pad = (K * dilation - dilation) // 2
    y = lax.conv_general_dilated(
        x_nct, weight, window_strides=(1,), padding=[(pad, pad)],
        rhs_dilation=(dilation,), dimension_numbers=("NCH", "OIH", "NCH"),
        precision=lax.Precision.HIGHEST)
    y = y + bias[None, :, None]
    return jnp.transpose(y, (0, 2, 1))


def mrf_forward_ref(x_ntc, params, slope):
    out = None
    for block in params:
        h = x_ntc
        for pair in block:
            t = h
            for (w, b, d) in pair:
                t = conv1d_lrelu_ref(t, w, b, d, slope)
            h = h + t
        out = h if out is None else out + h
    return out / len(params)


if __name__ == "__main__":
    # Synthetic TrainConfig (HiFi-GAN-like, small).
    cfg = SimpleNamespace(
        resblock_kernel_sizes=[3, 5],
        D_r=[[1, 1], [3, 1]],
        relu=0.1,
    )
    in_channels, N, T = 32, 2, 64

    key = jax.random.PRNGKey(0)
    kx, kp = jax.random.split(key)
    x_ncl = jax.random.normal(kx, (N, in_channels, T), jnp.float32)   # PyTorch NCL
    params = init_params(kp, cfg, in_channels)

    out_ncl = mrf_forward_pallas(x_ncl, params, cfg.relu)
    jax.block_until_ready(out_ncl)

    # Reference check against XLA dilated conv (f32 HIGHEST). The kernel stores
    # activations in bf16 and uses bf16 MXU operands (f32 accumulation), so the
    # tolerance is loosened accordingly.
    x_ntc = jnp.transpose(x_ncl, (0, 2, 1))
    ref_ncl = jnp.transpose(mrf_forward_ref(x_ntc, params, cfg.relu), (0, 2, 1))
    jax.block_until_ready(ref_ncl)

    assert out_ncl.shape == (N, in_channels, T)
    max_err = float(jnp.max(jnp.abs(out_ncl - ref_ncl)))
    assert jnp.allclose(out_ncl, ref_ncl, rtol=2e-2, atol=2e-2), max_err

    print("KERNEL_OK")
</pallas_src>

<mosaic_0001>
module attributes {stable_mosaic.version = 11 : i64} {
  func.func @_probe(%arg0: i32, %arg1: memref<8x128xf32, #tpu.memory_space<vmem>>, %arg2: memref<8x128xf32, #tpu.memory_space<vmem>>) attributes {dimension_semantics = [#tpu.dimension_semantics<arbitrary>], iteration_bounds = array<i64: 2>, scalar_prefetch = 0 : i64, scratch_operands = 0 : i64, tpu.core_type = #tpu.core_type<tc>, window_params = [{pipeline_mode = #tpu.pipeline_mode<synchronous>, transform_indices = @transform_0, window_bounds = array<i64: 8, 128>}, {pipeline_mode = #tpu.pipeline_mode<synchronous>, transform_indices = @transform_1, window_bounds = array<i64: 8, 128>}]} {
    %c0 = arith.constant 0 : index
    %c0_0 = arith.constant 0 : index
    %0 = vector.load %arg1[%c0, %c0_0] : memref<8x128xf32, #tpu.memory_space<vmem>>, vector<8x128xf32>
    %cst = arith.constant 1.000000e+00 : f32
    %1 = vector.broadcast %cst : f32 to vector<8x128xf32>
    %2 = arith.addf %0, %1 : vector<8x128xf32>
    %c0_1 = arith.constant 0 : index
    %c0_2 = arith.constant 0 : index
    %3 = vector.load %arg2[%c0_1, %c0_2] : memref<8x128xf32, #tpu.memory_space<vmem>>, vector<8x128xf32>
    tpu.vector_store %arg2[%c0_1, %c0_2], %2 {strides = array<i32>} : memref<8x128xf32, #tpu.memory_space<vmem>>, vector<8x128xf32>,
    return
  }
  func.func @transform_0(%arg0: i32) -> (i32, i32) {
    %c0_i32 = arith.constant 0 : i32
    %c0_i32_0 = arith.constant 0 : i32
    %c0_i32_1 = arith.constant 0 : i32
    return %c0_i32, %c0_i32_0 : i32, i32
  }
  func.func @transform_1(%arg0: i32) -> (i32, i32) {
    %c0_i32 = arith.constant 0 : i32
    %c0_i32_0 = arith.constant 0 : i32
    %c0_i32_1 = arith.constant 0 : i32
    return %c0_i32, %c0_i32_0 : i32, i32
  }
}

module attributes {stable_mosaic.version = 11 : i64} {
  func.func @_resblock_kernel(%arg0: i32, %arg1: i32, %arg2: memref<1x8x128xbf16, #tpu.memory_space<vmem>>, %arg3: memref<1x64x128xbf16, #tpu.memory_space<vmem>>, %arg4: memref<1x8x128xbf16, #tpu.memory_space<vmem>>, %arg5: memref<3x128x128xbf16, #tpu.memory_space<vmem>>, %arg6: memref<1x128xf32, #tpu.memory_space<vmem>>, %arg7: memref<3x128x128xbf16, #tpu.memory_space<vmem>>, %arg8: memref<1x128xf32, #tpu.memory_space<vmem>>, %arg9: memref<3x128x128xbf16, #tpu.memory_space<vmem>>, %arg10: memref<1x128xf32, #tpu.memory_space<vmem>>, %arg11: memref<3x128x128xbf16, #tpu.memory_space<vmem>>, %arg12: memref<1x128xf32, #tpu.memory_space<vmem>>, %arg13: memref<1x64x128xbf16, #tpu.memory_space<vmem>>) attributes {dimension_semantics = [#tpu.dimension_semantics<parallel>, #tpu.dimension_semantics<parallel>], iteration_bounds = array<i64: 1, 2>, scalar_prefetch = 0 : i64, scratch_operands = 0 : i64, tpu.core_type = #tpu.core_type<tc>, window_params = [{transform_indices = @transform_0, window_bounds = array<i64: 1, 8, 128>}, {transform_indices = @transform_1, window_bounds = array<i64: 1, 64, 128>}, {transform_indices = @transform_2, window_bounds = array<i64: 1, 8, 128>}, {pipeline_mode = #tpu.pipeline_mode<synchronous>, transform_indices = @transform_3, window_bounds = array<i64: 3, 128, 128>}, {pipeline_mode = #tpu.pipeline_mode<synchronous>, transform_indices = @transform_4, window_bounds = array<i64: 1, 128>}, {pipeline_mode = #tpu.pipeline_mode<synchronous>, transform_indices = @transform_5, window_bounds = array<i64: 3, 128, 128>}, {pipeline_mode = #tpu.pipeline_mode<synchronous>, transform_indices = @transform_6, window_bounds = array<i64: 1, 128>}, {pipeline_mode = #tpu.pipeline_mode<synchronous>, transform_indices = @transform_7, window_bounds = array<i64: 3, 128, 128>}, {pipeline_mode = #tpu.pipeline_mode<synchronous>, transform_indices = @transform_8, window_bounds = array<i64: 1, 128>}, {pipeline_mode = #tpu.pipeline_mode<synchronous>, transform_indices = @transform_9, window_bounds = array<i64: 3, 128, 128>}, {pipeline_mode = #tpu.pipeline_mode<synchronous>, transform_indices = @transform_10, window_bounds = array<i64: 1, 128>}, {transform_indices = @transform_11, window_bounds = array<i64: 1, 64, 128>}]} {
    %c64_i32 = arith.constant 64 : i32
    %0 = arith.muli %arg0, %c64_i32 : i32
    %c0 = arith.constant 0 : index
    %c0_0 = arith.constant 0 : index
    %c0_1 = arith.constant 0 : index
    %1 = vector.load %arg2[%c0, %c0_0, %c0_1] : memref<1x8x128xbf16, #tpu.memory_space<vmem>>, vector<1x8x128xbf16>
    %2 = vector.shape_cast %1 : vector<1x8x128xbf16> to vector<8x128xbf16>
    %c0_2 = arith.constant 0 : index
    %c0_3 = arith.constant 0 : index
    %c0_4 = arith.constant 0 : index
    %3 = vector.load %arg3[%c0_2, %c0_3, %c0_4] : memref<1x64x128xbf16, #tpu.memory_space<vmem>>, vector<1x64x128xbf16>
    %4 = vector.shape_cast %3 : vector<1x64x128xbf16> to vector<64x128xbf16>
    %c0_5 = arith.constant 0 : index
    %c0_6 = arith.constant 0 : index
    %c0_7 = arith.constant 0 : index
    %5 = vector.load %arg4[%c0_5, %c0_6, %c0_7] : memref<1x8x128xbf16, #tpu.memory_space<vmem>>, vector<1x8x128xbf16>
    %6 = vector.shape_cast %5 : vector<1x8x128xbf16> to vector<8x128xbf16>
    %7 = vector.extract_strided_slice %2 {offsets = [2, 0], sizes = [6, 128], strides = [1, 1]} : vector<8x128xbf16> to vector<6x128xbf16>
    %8 = arith.extf %7 : vector<6x128xbf16> to vector<6x128xf32>
    %9 = arith.extf %4 : vector<64x128xbf16> to vector<64x128xf32>
    %10 = vector.extract_strided_slice %6 {offsets = [0, 0], sizes = [6, 128], strides = [1, 1]} : vector<8x128xbf16> to vector<6x128xbf16>
    %11 = arith.extf %10 : vector<6x128xbf16> to vector<6x128xf32>
    %12 = tpu.concatenate %8, %9, %11 in 0 : vector<6x128xf32>, vector<64x128xf32>, vector<6x128xf32> -> vector<76x128xf32>
    %cst = arith.constant 0.000000e+00 : f32
    %13 = vector.broadcast %cst : f32 to vector<76x128xf32>
    %14 = arith.cmpf oge, %12, %13 : vector<76x128xf32>
    %cst_8 = arith.constant 1.000000e-01 : f32
    %15 = vector.broadcast %cst_8 : f32 to vector<76x128xf32>
    %16 = arith.mulf %12, %15 : vector<76x128xf32>
    %17 = arith.select %14, %12, %16 : vector<76x128xi1>, vector<76x128xf32>
    %18 = arith.truncf %17 : vector<76x128xf32> to vector<76x128xbf16>
    %19 = vector.extract_strided_slice %18 {offsets = [0, 0], sizes = [74, 128], strides = [1, 1]} : vector<76x128xbf16> to vector<74x128xbf16>
    %c0_9 = arith.constant 0 : index
    %c0_10 = arith.constant 0 : index
    %c0_11 = arith.constant 0 : index
    %20 = vector.load %arg5[%c0_9, %c0_10, %c0_11] : memref<3x128x128xbf16, #tpu.memory_space<vmem>>, vector<1x128x128xbf16>
    %21 = vector.shape_cast %20 : vector<1x128x128xbf16> to vector<128x128xbf16>
    %cst_12 = arith.constant dense<0.000000e+00> : vector<74x128xf32>
    %22 = tpu.matmul %19, %21, %cst_12 {dimension_numbers = #tpu.dot_dimension_numbers<[1], [0], [0], [1], [0, 0, 1, 1], [], []>} : vector<74x128xbf16>, vector<128x128xbf16>, vector<74x128xf32> -> vector<74x128xf32>
    %23 = vector.extract_strided_slice %18 {offsets = [1, 0], sizes = [74, 128], strides = [1, 1]} : vector<76x128xbf16> to vector<74x128xbf16>
    %c1 = arith.constant 1 : index
    %c0_13 = arith.constant 0 : index
    %c0_14 = arith.constant 0 : index
    %24 = vector.load %arg5[%c1, %c0_13, %c0_14] : memref<3x128x128xbf16, #tpu.memory_space<vmem>>, vector<1x128x128xbf16>
    %25 = vector.shape_cast %24 : vector<1x128x128xbf16> to vector<128x128xbf16>
    %cst_15 = arith.constant dense<0.000000e+00> : vector<74x128xf32>
    %26 = tpu.matmul %23, %25, %cst_15 {dimension_numbers = #tpu.dot_dimension_numbers<[1], [0], [0], [1], [0, 0, 1, 1], [], []>} : vector<74x128xbf16>, vector<128x128xbf16>, vector<74x128xf32> -> vector<74x128xf32>
    %27 = arith.addf %22, %26 : vector<74x128xf32>
    %28 = vector.extract_strided_slice %18 {offsets = [2, 0], sizes = [74, 128], strides = [1, 1]} : vector<76x128xbf16> to vector<74x128xbf16>
    %c2 = arith.constant 2 : index
    %c0_16 = arith.constant 0 : index
    %c0_17 = arith.constant 0 : index
    %29 = vector.load %arg5[%c2, %c0_16, %c0_17] : memref<3x128x128xbf16, #tpu.memory_space<vmem>>, vector<1x128x128xbf16>
    %30 = vector.shape_cast %29 : vector<1x128x128xbf16> to vector<128x128xbf16>
    %cst_18 = arith.constant dense<0.000000e+00> : vector<74x128xf32>
    %31 = tpu.matmul %28, %30, %cst_18 {dimension_numbers = #tpu.dot_dimension_numbers<[1], [0], [0], [1], [0, 0, 1, 1], [], []>} : vector<74x128xbf16>, vector<128x128xbf16>, vector<74x128xf32> -> vector<74x128xf32>
    %32 = arith.addf %27, %31 : vector<74x128xf32>
    %c0_19 = arith.constant 0 : index
    %c0_20 = arith.constant 0 : index
    %33 = vector.load %arg6[%c0_19, %c0_20] : memref<1x128xf32, #tpu.memory_space<vmem>>, vector<1x128xf32>
    %34 = vector.broadcast %33 : vector<1x128xf32> to vector<74x128xf32>
    %35 = arith.addf %32, %34 : vector<74x128xf32>
    %c5_i32 = arith.constant 5 : i32
    %36 = arith.subi %0, %c5_i32 : i32
    %37 = tpu.iota {dimensions = array<i32: 0>} : vector<74x1xi32>
    %38 = vector.broadcast %36 : i32 to vector<74x1xi32>
    %39 = arith.addi %38, %37 : vector<74x1xi32>
    %c0_i32 = arith.constant 0 : i32
    %40 = vector.broadcast %c0_i32 : i32 to vector<74x1xi32>
    %41 = arith.cmpi sge, %39, %40 : vector<74x1xi32>
    %c64_i32_21 = arith.constant 64 : i32
    %42 = vector.broadcast %c64_i32_21 : i32 to vector<74x1xi32>
    %43 = arith.cmpi slt, %39, %42 : vector<74x1xi32>
    %44 = arith.andi %41, %43 : vector<74x1xi1>
    %cst_22 = arith.constant 0.000000e+00 : f32
    %45 = vector.shape_cast %44 : vector<74x1xi1> to vector<74x1xi1>
    %46 = vector.broadcast %45 : vector<74x1xi1> to vector<74x128xi1>
    %47 = vector.broadcast %cst_22 : f32 to vector<74x128xf32>
    %48 = arith.select %46, %35, %47 : vector<74x128xi1>, vector<74x128xf32>
    %cst_23 = arith.constant 0.000000e+00 : f32
    %49 = vector.broadcast %cst_23 : f32 to vector<74x128xf32>
    %50 = arith.cmpf oge, %48, %49 : vector<74x128xf32>
    %cst_24 = arith.constant 1.000000e-01 : f32
    %51 = vector.broadcast %cst_24 : f32 to vector<74x128xf32>
    %52 = arith.mulf %48, %51 : vector<74x128xf32>
    %53 = arith.select %50, %48, %52 : vector<74x128xi1>, vector<74x128xf32>
    %54 = arith.truncf %53 : vector<74x128xf32> to vector<74x128xbf16>
    %55 = vector.extract_strided_slice %54 {offsets = [0, 0], sizes = [72, 128], strides = [1, 1]} : vector<74x128xbf16> to vector<72x128xbf16>
    %c0_25 = arith.constant 0 : index
    %c0_26 = arith.constant 0 : index
    %c0_27 = arith.constant 0 : index
    %56 = vector.load %arg7[%c0_25, %c0_26, %c0_27] : memref<3x128x128xbf16, #tpu.memory_space<vmem>>, vector<1x128x128xbf16>
    %57 = vector.shape_cast %56 : vector<1x128x128xbf16> to vector<128x128xbf16>
    %cst_28 = arith.constant dense<0.000000e+00> : vector<72x128xf32>
    %58 = tpu.matmul %55, %57, %cst_28 {dimension_numbers = #tpu.dot_dimension_numbers<[1], [0], [0], [1], [0, 0, 1, 1], [], []>} : vector<72x128xbf16>, vector<128x128xbf16>, vector<72x128xf32> -> vector<72x128xf32>
    %59 = vector.extract_strided_slice %54 {offsets = [1, 0], sizes = [72, 128], strides = [1, 1]} : vector<74x128xbf16> to vector<72x128xbf16>
    %c1_29 = arith.constant 1 : index
    %c0_30 = arith.constant 0 : index
    %c0_31 = arith.constant 0 : index
    %60 = vector.load %arg7[%c1_29, %c0_30, %c0_31] : memref<3x128x128xbf16, #tpu.memory_space<vmem>>, vector<1x128x128xbf16>
    %61 = vector.shape_cast %60 : vector<1x128x128xbf16> to vector<128x128xbf16>
    %cst_32 = arith.constant dense<0.000000e+00> : vector<72x128xf32>
    %62 = tpu.matmul %59, %61, %cst_32 {dimension_numbers = #tpu.dot_dimension_numbers<[1], [0], [0], [1], [0, 0, 1, 1], [], []>} : vector<72x128xbf16>, vector<128x128xbf16>, vector<72x128xf32> -> vector<72x128xf32>
    %63 = arith.addf %58, %62 : vector<72x128xf32>
    %64 = vector.extract_strided_slice %54 {offsets = [2, 0], sizes = [72, 128], strides = [1, 1]} : vector<74x128xbf16> to vector<72x128xbf16>
    %c2_33 = arith.constant 2 : index
    %c0_34 = arith.constant 0 : index
    %c0_35 = arith.constant 0 : index
    %65 = vector.load %arg7[%c2_33, %c0_34, %c0_35] : memref<3x128x128xbf16, #tpu.memory_space<vmem>>, vector<1x128x128xbf16>
    %66 = vector.shape_cast %65 : vector<1x128x128xbf16> to vector<128x128xbf16>
    %cst_36 = arith.constant dense<0.000000e+00> : vector<72x128xf32>
    %67 = tpu.matmul %64, %66, %cst_36 {dimension_numbers = #tpu.dot_dimension_numbers<[1], [0], [0], [1], [0, 0, 1, 1], [], []>} : vector<72x128xbf16>, vector<128x128xbf16>, vector<72x128xf32> -> vector<72x128xf32>
    %68 = arith.addf %63, %67 : vector<72x128xf32>
    %c0_37 = arith.constant 0 : index
    %c0_38 = arith.constant 0 : index
    %69 = vector.load %arg8[%c0_37, %c0_38] : memref<1x128xf32, #tpu.memory_space<vmem>>, vector<1x128xf32>
    %70 = vector.broadcast %69 : vector<1x128xf32> to vector<72x128xf32>
    %71 = arith.addf %68, %70 : vector<72x128xf32>
    %72 = vector.extract_strided_slice %12 {offsets = [2, 0], sizes = [72, 128], strides = [1, 1]} : vector<76x128xf32> to vector<72x128xf32>
    %73 = arith.addf %72, %71 : vector<72x128xf32>
    %c4_i32 = arith.constant 4 : i32
    %74 = arith.subi %0, %c4_i32 : i32
    %75 = tpu.iota {dimensions = array<i32: 0>} : vector<72x1xi32>
    %76 = vector.broadcast %74 : i32 to vector<72x1xi32>
    %77 = arith.addi %76, %75 : vector<72x1xi32>
    %c0_i32_39 = arith.constant 0 : i32
    %78 = vector.broadcast %c0_i32_39 : i32 to vector<72x1xi32>
    %79 = arith.cmpi sge, %77, %78 : vector<72x1xi32>
    %c64_i32_40 = arith.constant 64 : i32
    %80 = vector.broadcast %c64_i32_40 : i32 to vector<72x1xi32>
    %81 = arith.cmpi slt, %77, %80 : vector<72x1xi32>
    %82 = arith.andi %79, %81 : vector<72x1xi1>
    %cst_41 = arith.constant 0.000000e+00 : f32
    %83 = vector.shape_cast %82 : vector<72x1xi1> to vector<72x1xi1>
    %84 = vector.broadcast %83 : vector<72x1xi1> to vector<72x128xi1>
    %85 = vector.broadcast %cst_41 : f32 to vector<72x128xf32>
    %86 = arith.select %84, %73, %85 : vector<72x128xi1>, vector<72x128xf32>
    %cst_42 = arith.constant 0.000000e+00 : f32
    %87 = vector.broadcast %cst_42 : f32 to vector<72x128xf32>
    %88 = arith.cmpf oge, %86, %87 : vector<72x128xf32>
    %cst_43 = arith.constant 1.000000e-01 : f32
    %89 = vector.broadcast %cst_43 : f32 to vector<72x128xf32>
    %90 = arith.mulf %86, %89 : vector<72x128xf32>
    %91 = arith.select %88, %86, %90 : vector<72x128xi1>, vector<72x128xf32>
    %92 = arith.truncf %91 : vector<72x128xf32> to vector<72x128xbf16>
    %93 = vector.extract_strided_slice %92 {offsets = [0, 0], sizes = [66, 128], strides = [1, 1]} : vector<72x128xbf16> to vector<66x128xbf16>
    %c0_44 = arith.constant 0 : index
    %c0_45 = arith.constant 0 : index
    %c0_46 = arith.constant 0 : index
    %94 = vector.load %arg9[%c0_44, %c0_45, %c0_46] : memref<3x128x128xbf16, #tpu.memory_space<vmem>>, vector<1x128x128xbf16>
    %95 = vector.shape_cast %94 : vector<1x128x128xbf16> to vector<128x128xbf16>
    %cst_47 = arith.constant dense<0.000000e+00> : vector<66x128xf32>
    %96 = tpu.matmul %93, %95, %cst_47 {dimension_numbers = #tpu.dot_dimension_numbers<[1], [0], [0], [1], [0, 0, 1, 1], [], []>} : vector<66x128xbf16>, vector<128x128xbf16>, vector<66x128xf32> -> vector<66x128xf32>
    %97 = vector.extract_strided_slice %92 {offsets = [3, 0], sizes = [66, 128], strides = [1, 1]} : vector<72x128xbf16> to vector<66x128xbf16>
    %c1_48 = arith.constant 1 : index
    %c0_49 = arith.constant 0 : index
    %c0_50 = arith.constant 0 : index
    %98 = vector.load %arg9[%c1_48, %c0_49, %c0_50] : memref<3x128x128xbf16, #tpu.memory_space<vmem>>, vector<1x128x128xbf16>
    %99 = vector.shape_cast %98 : vector<1x128x128xbf16> to vector<128x128xbf16>
    %cst_51 = arith.constant dense<0.000000e+00> : vector<66x128xf32>
    %100 = tpu.matmul %97, %99, %cst_51 {dimension_numbers = #tpu.dot_dimension_numbers<[1], [0], [0], [1], [0, 0, 1, 1], [], []>} : vector<66x128xbf16>, vector<128x128xbf16>, vector<66x128xf32> -> vector<66x128xf32>
    %101 = arith.addf %96, %100 : vector<66x128xf32>
    %102 = vector.extract_strided_slice %92 {offsets = [6, 0], sizes = [66, 128], strides = [1, 1]} : vector<72x128xbf16> to vector<66x128xbf16>
    %c2_52 = arith.constant 2 : index
    %c0_53 = arith.constant 0 : index
    %c0_54 = arith.constant 0 : index
    %103 = vector.load %arg9[%c2_52, %c0_53, %c0_54] : memref<3x128x128xbf16, #tpu.memory_space<vmem>>, vector<1x128x128xbf16>
    %104 = vector.shape_cast %103 : vector<1x128x128xbf16> to vector<128x128xbf16>
    %cst_55 = arith.constant dense<0.000000e+00> : vector<66x128xf32>
    %105 = tpu.matmul %102, %104, %cst_55 {dimension_numbers = #tpu.dot_dimension_numbers<[1], [0], [0], [1], [0, 0, 1, 1], [], []>} : vector<66x128xbf16>, vector<128x128xbf16>, vector<66x128xf32> -> vector<66x128xf32>
    %106 = arith.addf %101, %105 : vector<66x128xf32>
    %c0_56 = arith.constant 0 : index
    %c0_57 = arith.constant 0 : index
    %107 = vector.load %arg10[%c0_56, %c0_57] : memref<1x128xf32, #tpu.memory_space<vmem>>, vector<1x128xf32>
    %108 = vector.broadcast %107 : vector<1x128xf32> to vector<66x128xf32>
    %109 = arith.addf %106, %108 : vector<66x128xf32>
    %c1_i32 = arith.constant 1 : i32
    %110 = arith.subi %0, %c1_i32 : i32
    %111 = tpu.iota {dimensions = array<i32: 0>} : vector<66x1xi32>
    %112 = vector.broadcast %110 : i32 to vector<66x1xi32>
    %113 = arith.addi %112, %111 : vector<66x1xi32>
    %c0_i32_58 = arith.constant 0 : i32
    %114 = vector.broadcast %c0_i32_58 : i32 to vector<66x1xi32>
    %115 = arith.cmpi sge, %113, %114 : vector<66x1xi32>
    %c64_i32_59 = arith.constant 64 : i32
    %116 = vector.broadcast %c64_i32_59 : i32 to vector<66x1xi32>
    %117 = arith.cmpi slt, %113, %116 : vector<66x1xi32>
    %118 = arith.andi %115, %117 : vector<66x1xi1>
    %cst_60 = arith.constant 0.000000e+00 : f32
    %119 = vector.shape_cast %118 : vector<66x1xi1> to vector<66x1xi1>
    %120 = vector.broadcast %119 : vector<66x1xi1> to vector<66x128xi1>
    %121 = vector.broadcast %cst_60 : f32 to vector<66x128xf32>
    %122 = arith.select %120, %109, %121 : vector<66x128xi1>, vector<66x128xf32>
    %cst_61 = arith.constant 0.000000e+00 : f32
    %123 = vector.broadcast %cst_61 : f32 to vector<66x128xf32>
    %124 = arith.cmpf oge, %122, %123 : vector<66x128xf32>
    %cst_62 = arith.constant 1.000000e-01 : f32
    %125 = vector.broadcast %cst_62 : f32 to vector<66x128xf32>
    %126 = arith.mulf %122, %125 : vector<66x128xf32>
    %127 = arith.select %124, %122, %126 : vector<66x128xi1>, vector<66x128xf32>
    %128 = arith.truncf %127 : vector<66x128xf32> to vector<66x128xbf16>
    %129 = vector.extract_strided_slice %128 {offsets = [0, 0], sizes = [64, 128], strides = [1, 1]} : vector<66x128xbf16> to vector<64x128xbf16>
    %c0_63 = arith.constant 0 : index
    %c0_64 = arith.constant 0 : index
    %c0_65 = arith.constant 0 : index
    %130 = vector.load %arg11[%c0_63, %c0_64, %c0_65] : memref<3x128x128xbf16, #tpu.memory_space<vmem>>, vector<1x128x128xbf16>
    %131 = vector.shape_cast %130 : vector<1x128x128xbf16> to vector<128x128xbf16>
    %cst_66 = arith.constant dense<0.000000e+00> : vector<64x128xf32>
    %132 = tpu.matmul %129, %131, %cst_66 {dimension_numbers = #tpu.dot_dimension_numbers<[1], [0], [0], [1], [0, 0, 1, 1], [], []>} : vector<64x128xbf16>, vector<128x128xbf16>, vector<64x128xf32> -> vector<64x128xf32>
    %133 = vector.extract_strided_slice %128 {offsets = [1, 0], sizes = [64, 128], strides = [1, 1]} : vector<66x128xbf16> to vector<64x128xbf16>
    %c1_67 = arith.constant 1 : index
    %c0_68 = arith.constant 0 : index
    %c0_69 = arith.constant 0 : index
    %134 = vector.load %arg11[%c1_67, %c0_68, %c0_69] : memref<3x128x128xbf16, #tpu.memory_space<vmem>>, vector<1x128x128xbf16>
    %135 = vector.shape_cast %134 : vector<1x128x128xbf16> to vector<128x128xbf16>
    %cst_70 = arith.constant dense<0.000000e+00> : vector<64x128xf32>
    %136 = tpu.matmul %133, %135, %cst_70 {dimension_numbers = #tpu.dot_dimension_numbers<[1], [0], [0], [1], [0, 0, 1, 1], [], []>} : vector<64x128xbf16>, vector<128x128xbf16>, vector<64x128xf32> -> vector<64x128xf32>
    %137 = arith.addf %132, %136 : vector<64x128xf32>
    %138 = vector.extract_strided_slice %128 {offsets = [2, 0], sizes = [64, 128], strides = [1, 1]} : vector<66x128xbf16> to vector<64x128xbf16>
    %c2_71 = arith.constant 2 : index
    %c0_72 = arith.constant 0 : index
    %c0_73 = arith.constant 0 : index
    %139 = vector.load %arg11[%c2_71, %c0_72, %c0_73] : memref<3x128x128xbf16, #tpu.memory_space<vmem>>, vector<1x128x128xbf16>
    %140 = vector.shape_cast %139 : vector<1x128x128xbf16> to vector<128x128xbf16>
    %cst_74 = arith.constant dense<0.000000e+00> : vector<64x128xf32>
    %141 = tpu.matmul %138, %140, %cst_74 {dimension_numbers = #tpu.dot_dimension_numbers<[1], [0], [0], [1], [0, 0, 1, 1], [], []>} : vector<64x128xbf16>, vector<128x128xbf16>, vector<64x128xf32> -> vector<64x128xf32>
    %142 = arith.addf %137, %141 : vector<64x128xf32>
    %c0_75 = arith.constant 0 : index
    %c0_76 = arith.constant 0 : index
    %143 = vector.load %arg12[%c0_75, %c0_76] : memref<1x128xf32, #tpu.memory_space<vmem>>, vector<1x128xf32>
    %144 = vector.broadcast %143 : vector<1x128xf32> to vector<64x128xf32>
    %145 = arith.addf %142, %144 : vector<64x128xf32>
    %146 = vector.extract_strided_slice %86 {offsets = [4, 0], sizes = [64, 128], strides = [1, 1]} : vector<72x128xf32> to vector<64x128xf32>
    %147 = arith.addf %146, %145 : vector<64x128xf32>
    %148 = arith.truncf %147 : vector<64x128xf32> to vector<64x128xbf16>
    %c0_77 = arith.constant 0 : index
    %c0_78 = arith.constant 0 : index
    %c0_79 = arith.constant 0 : index
    %149 = vector.load %arg13[%c0_77, %c0_78, %c0_79] : memref<1x64x128xbf16, #tpu.memory_space<vmem>>, vector<1x64x128xbf16>
    %150 = vector.shape_cast %149 : vector<1x64x128xbf16> to vector<64x128xbf16>
    %151 = vector.shape_cast %148 : vector<64x128xbf16> to vector<1x64x128xbf16>
    tpu.vector_store %arg13[%c0_77, %c0_78, %c0_79], %151 {strides = array<i32>} : memref<1x64x128xbf16, #tpu.memory_space<vmem>>, vector<1x64x128xbf16>,
    return
  }
  func.func @transform_0(%arg0: i32, %arg1: i32) -> (i32, i32, i32) {
    %c1_i32 = arith.constant 1 : i32
    %0 = arith.addi %arg0, %c1_i32 : i32
    %c8_i32 = arith.constant 8 : i32
    %1 = arith.muli %0, %c8_i32 : i32
    %c1_i32_0 = arith.constant 1 : i32
    %2 = arith.subi %1, %c1_i32_0 : i32
    %c0_i32 = arith.constant 0 : i32
    %c0_i32_1 = arith.constant 0 : i32
    return %arg1, %2, %c0_i32 : i32, i32, i32
  }
  func.func @transform_1(%arg0: i32, %arg1: i32) -> (i32, i32, i32) {
    %c1_i32 = arith.constant 1 : i32
    %0 = arith.addi %arg0, %c1_i32 : i32
    %c0_i32 = arith.constant 0 : i32
    %c0_i32_0 = arith.constant 0 : i32
    return %arg1, %0, %c0_i32 : i32, i32, i32
  }
  func.func @transform_2(%arg0: i32, %arg1: i32) -> (i32, i32, i32) {
    %c2_i32 = arith.constant 2 : i32
    %0 = arith.addi %arg0, %c2_i32 : i32
    %c8_i32 = arith.constant 8 : i32
    %1 = arith.muli %0, %c8_i32 : i32
    %c0_i32 = arith.constant 0 : i32
    %c0_i32_0 = arith.constant 0 : i32
    return %arg1, %1, %c0_i32 : i32, i32, i32
  }
  func.func @transform_3(%arg0: i32, %arg1: i32) -> (i32, i32, i32) {
    %c0_i32 = arith.constant 0 : i32
    %c0_i32_0 = arith.constant 0 : i32
    %c0_i32_1 = arith.constant 0 : i32
    %c0_i32_2 = arith.constant 0 : i32
    return %c0_i32, %c0_i32_0, %c0_i32_1 : i32, i32, i32
  }
  func.func @transform_4(%arg0: i32, %arg1: i32) -> (i32, i32) {
    %c0_i32 = arith.constant 0 : i32
    %c0_i32_0 = arith.constant 0 : i32
    %c0_i32_1 = arith.constant 0 : i32
    return %c0_i32, %c0_i32_0 : i32, i32
  }
  func.func @transform_5(%arg0: i32, %arg1: i32) -> (i32, i32, i32) {
    %c0_i32 = arith.constant 0 : i32
    %c0_i32_0 = arith.constant 0 : i32
    %c0_i32_1 = arith.constant 0 : i32
    %c0_i32_2 = arith.constant 0 : i32
    return %c0_i32, %c0_i32_0, %c0_i32_1 : i32, i32, i32
  }
  func.func @transform_6(%arg0: i32, %arg1: i32) -> (i32, i32) {
    %c0_i32 = arith.constant 0 : i32
    %c0_i32_0 = arith.constant 0 : i32
    %c0_i32_1 = arith.constant 0 : i32
    return %c0_i32, %c0_i32_0 : i32, i32
  }
  func.func @transform_7(%arg0: i32, %arg1: i32) -> (i32, i32, i32) {
    %c0_i32 = arith.constant 0 : i32
    %c0_i32_0 = arith.constant 0 : i32
    %c0_i32_1 = arith.constant 0 : i32
    %c0_i32_2 = arith.constant 0 : i32
    return %c0_i32, %c0_i32_0, %c0_i32_1 : i32, i32, i32
  }
  func.func @transform_8(%arg0: i32, %arg1: i32) -> (i32, i32) {
    %c0_i32 = arith.constant 0 : i32
    %c0_i32_0 = arith.constant 0 : i32
    %c0_i32_1 = arith.constant 0 : i32
    return %c0_i32, %c0_i32_0 : i32, i32
  }
  func.func @transform_9(%arg0: i32, %arg1: i32) -> (i32, i32, i32) {
    %c0_i32 = arith.constant 0 : i32
    %c0_i32_0 = arith.constant 0 : i32
    %c0_i32_1 = arith.constant 0 : i32
    %c0_i32_2 = arith.constant 0 : i32
    return %c0_i32, %c0_i32_0, %c0_i32_1 : i32, i32, i32
  }
  func.func @transform_10(%arg0: i32, %arg1: i32) -> (i32, i32) {
    %c0_i32 = arith.constant 0 : i32
    %c0_i32_0 = arith.constant 0 : i32
    %c0_i32_1 = arith.constant 0 : i32
    return %c0_i32, %c0_i32_0 : i32, i32
  }
  func.func @transform_11(%arg0: i32, %arg1: i32) -> (i32, i32, i32) {
    %c1_i32 = arith.constant 1 : i32
    %0 = arith.addi %arg0, %c1_i32 : i32
    %c0_i32 = arith.constant 0 : i32
    %c0_i32_0 = arith.constant 0 : i32
    return %arg1, %0, %c0_i32 : i32, i32, i32
  }
}

</mosaic_0001>

<bundles_post_ra>
// kernel: tpu_custom_call.1
= control target key start
LH: loop header
LB: loop body
LE: loop exit
PB: predicated region body
PF: predicated region fallthrough
CT: control target
= control target key end

     0   :  { %6 = vsyncpa [#allocation3], 0  ;;  %s341_s0 = inlined_call_operand.hbm [shape: f32[8,128], index: 0, kind: input, shape index: {}]   ;;  %s342_s1 = inlined_call_operand.hbm [shape: f32[8,128], index: 1, kind: output, shape index: {}]  }
   0x1   :  { %7 = vsyncpa [#allocation4], 0  ;;  %s262_s6 = smov 0  }
   0x2 LB: > { %s145_s7 = sadd.s32 4294967295, %s248_s6   ;;  %p146_p0 = scmp.ge.s32.totalorder %s248_s6, 1  ;;  %s248_s6 = sphi %s262_s6, %s13_s6  }
   0x3   : > { %p60_p1 = scmp.lt.s32.totalorder %s248_s6, 3  ;;  %p276_p3 = scmp.eq.s32.totalorder %s145_s7, 0 }
   0x4   : > { %s250_s10 = smov [#allocation2]   ;;  %s180_s15 = scalar_lea.hbm %s341_s0, 128 }
   0x5   : > { %p270_p2 = pnand %p146_p0, %p60_p1  ;;  %s73_s11 = sshll.u32 %s250_s10, 4  ;;  %s74_s11 = int_to_ptr.vmem [resolvable:$true] %s73_s11 }
   0x6   : > { %s347_s9 = scalar_select %p276_p3, 1, 0 }
   0x7   : > { %s346_s8 = scalar_select %p270_p2, 1, 0 }
   0x8   : > { %p162_p4 = pneg %p270_p2  ;;  %p181_p6 = scmp.ne.s32.totalorder %s341_s0, %s180_s15 }
   0x9   : > { %p187_p10 = scmp.lt.u32.totalorder %s180_s15, %s341_s0 }
   0xa   : > { %p284_p5 = pnand %p276_p3, %p162_p4 }
   0xc   : > { %p182_p7 = pneg %p284_p5 }
   0xe   : > { %p183_p8 = pnand %p182_p7, %p181_p6 }
  0x10   : > { %p184_p9 = pneg %p183_p8 }
  0x12   : > { %p189_p11 = pnand %p187_p10, %p184_p9 }
  0x14   : > { %192 = shalt.err (!%p189_p11)
}
  0x15   : > { %s193_s20 = scalar_lea.vmem %s74_s11, 128  ;;  %p201_p1 = scmp.lt.s32.totalorder %s74_s11, %s74_s11 }
  0x16   : > { %p194_p12 = scmp.ne.s32.totalorder %s74_s11, %s193_s20  ;;  %p202_p4 = scmp.lt.s32.totalorder %s193_s20, %s193_s20 }
  0x18   : > { %p196_p13 = pnand %p194_p12, %p182_p7  ;;  %p203_p3 = por %p202_p4, %p201_p1 }
  0x1a   : > { %p197_p0 = pneg %p196_p13 }
  0x1c   : > { %p204_p2 = pnand %p203_p3, %p197_p0 }
  0x1e   : > { %207 = shalt.err (!%p204_p2)
}
  0x1f   : > { %165 = dma.hbm_to_vmem [thread:$0]  (!%p284_p5), %s341_s0, 128, %s74_s11, [#allocation3]  }
  0x20   : > { %p349_p6 = scmp.ne.s32.totalorder %s346_s8, 0 }
  0x21   : > { %p350_p8 = scmp.ne.s32.totalorder (!%p349_p6), %s347_s9, 0 }
  0x22   : > { %86 = sbr.rel (%p349_p6) target bundleno = 67 (0x43), region = 24 }
  0x29   : > { %239 = dma.done.wait (%p350_p8), [#allocation3], 128  }
  0x2a   : > { %241 = vsyncadd (%p350_p8), [#allocation3], 4294967168  ;;  %s251_s23 = smov [#allocation5]   ;;  %v96_v0 = vld [vmem:[#allocation2] sm:$0xff]  ;;  %p312_p2 = scmp.eq.s32.totalorder %s145_s7, 1 }
  0x2b   : > { %s106_s24 = sshll.u32 %s251_s23, 4  ;;  %v97_v1 = vadd.f32 1.0, %v96_v0  ;;  %s107_s24 = int_to_ptr.vmem [resolvable:$true] %s106_s24 }
  0x2c   : > { %s208_s26 = scalar_lea.vmem %s107_s24, 128  ;;  %p215_p9 = scmp.lt.s32.totalorder %s107_s24, %s107_s24 }
  0x2d   : > { %98 = vst [vmem:[#allocation5] sm:$0xff] %v97_v1  ;;  %p209_p3 = scmp.ne.s32.totalorder %s107_s24, %s208_s26  ;;  %p216_p10 = scmp.lt.s32.totalorder %s208_s26, %s208_s26 }
  0x2f   : > { %p210_p5 = pnand %p209_p3, %p312_p2  ;;  %p217_p11 = por %p216_p10, %p215_p9 }
  0x31   : > { %p211_p7 = pneg %p210_p5 }
  0x33   : > { %p218_p12 = pnand %p217_p11, %p211_p7 }
  0x35   : > { %221 = shalt.err (!%p218_p12)
}
  0x36   : > { %s222_s29 = scalar_lea.hbm %s342_s1, 128 }
  0x37   : > { %p223_p13 = scmp.ne.s32.totalorder %s342_s1, %s222_s29  ;;  %p228_p4 = scmp.lt.u32.totalorder %s222_s29, %s342_s1 }
  0x39   : > { %p224_p0 = pnand %p223_p13, %p312_p2 }
  0x3b   : > { %p225_p1 = pneg %p224_p0 }
  0x3d   : > { %p230_p6 = pnand %p228_p4, %p225_p1 }
  0x3f   : > { %233 = shalt.err (!%p230_p6)
}
  0x40   : > { %159 = dma.vmem_to_hbm [thread:$0]  (%p312_p2), %s107_s24, 128, %s342_s1, [#allocation4]  }
  0x41   : > { %243 = dma.done.wait (%p312_p2), [#allocation4], 128  }
  0x42   : > { %245 = vsyncadd (%p312_p2), [#allocation4], 4294967168 }
  0x43 PF: > { %s13_s6 = sadd.s32 1, %s248_s6  }
  0x44   : > { %p10_p8 = scmp.ge.s32.totalorder %s13_s6, 4  }
  0x46   :  { %12 = sbr.rel (!%p10_p8) target bundleno = 2 (0x2), region = 53 }
  0x4d   :  { %119 = vsyncpa [#allocation3], 1 }
  0x4e   :  { %121 = vsyncpa [#allocation3 + $0x1], 1 }
  0x4f   :  { %122 = vsyncpa [#allocation4], 1 }
  0x50   :  { %124 = vsyncpa [#allocation4 + $0x1], 1 }

// kernel: tpu_custom_call.1
= control target key start
LH: loop header
LB: loop body
LE: loop exit
PB: predicated region body
PF: predicated region fallthrough
CT: control target
= control target key end

     0   :  { %s5619_s0 = inlined_call_operand.hbm [shape: bf16[2,192,128], index: 0, kind: input, shape index: {}]   ;;  %s5620_s1 = inlined_call_operand.hbm [shape: bf16[2,192,128], index: 1, kind: input, shape index: {}]   ;;  %s5621_s2 = inlined_call_operand.hbm [shape: bf16[2,192,128], index: 2, kind: input, shape index: {}]   ;;  %s5622_s3 = inlined_call_operand.hbm [shape: bf16[3,128,128], index: 3, kind: input, shape index: {}]   ;;  %s5623_s4 = inlined_call_operand.vmem [shape: f32[1,128], index: 4, kind: input, shape index: {}]   ;;  %s5624_s5 = inlined_call_operand.hbm [shape: bf16[3,128,128], index: 5, kind: input, shape index: {}]   ;;  %s5625_s6 = inlined_call_operand.vmem [shape: f32[1,128], index: 6, kind: input, shape index: {}]   ;;  %s5626_s7 = inlined_call_operand.hbm [shape: bf16[3,128,128], index: 7, kind: input, shape index: {}]   ;;  %s5627_s8 = inlined_call_operand.vmem [shape: f32[1,128], index: 8, kind: input, shape index: {}]   ;;  %s5628_s9 = inlined_call_operand.hbm [shape: bf16[3,128,128], index: 9, kind: input, shape index: {}]   ;;  %s5629_s10 = inlined_call_operand.vmem [shape: f32[1,128], index: 10, kind: input, shape index: {}]   ;;  %s5630_s11 = inlined_call_operand.hbm [shape: bf16[2,192,128], index: 11, kind: output, shape index: {}]  }
   0x1   :  { %5657 = sst [smem:[#allocation29_spill]] %s5620_s1 }
   0x2   :  { %5658 = sst [smem:[#allocation30_spill]] %s5622_s3 }
   0x3   :  { %5659 = sst [smem:[#allocation31_spill]] %s5625_s6 }
   0x4   :  { %5660 = sst [smem:[#allocation32_spill]] %s5626_s7 }
   0x5   :  { %5661 = sst [smem:[#allocation33_spill]] %s5627_s8 }
   0x6   :  { %5662 = sst [smem:[#allocation34_spill]] %s5629_s10 }
   0x7   :  { %5663 = sst [smem:[#allocation35_spill]] %s5630_s11 }
   0x8   :  { %16 = vsyncpa [#allocation3], 0 }
   0x9   :  { %18 = vsyncpa [#allocation3 + $0x1], 0 }
   0xa   :  { %19 = vsyncpa [#allocation6], 0 }
   0xb   :  { %21 = vsyncpa [#allocation6 + $0x1], 0 }
   0xc   :  { %22 = vsyncpa [#allocation9], 0 }
   0xd   :  { %23 = vsyncpa [#allocation12], 0 }
   0xe   :  { %24 = vsyncpa [#allocation4], 0 }
   0xf   :  { %26 = vsyncpa [#allocation4 + $0x1], 0  ;;  %s4693_s17 = smov 0   ;;  %s4695_s18 = smov 0  }
  0x10   :  { %s4697_s19 = smov 0   ;;  %s4699_s20 = smov 0  }
  0x11   :  { %s4701_s21 = smov 0   ;;  %s4703_s22 = smov 0  }
  0x12 LB: > { %5664 = sst [smem:[#allocation20_spill]] %s4597_s17  ;;  %s4724_s23 = sadd.s32 4294967295, %s4617_s22   ;;  %s4617_s22 = sphi %s4703_s22, %s32_s22   ;;  %s4613_s21 = sphi %s4701_s21, %s5719_s21   ;;  %s4609_s20 = sphi %s4699_s20, %s5715_s20   ;;  %s4605_s19 = sphi %s4697_s19, %s5714_s19   ;;  %s4601_s18 = sphi %s4695_s18, %s5718_s18   ;;  %s4597_s17 = sphi %s4693_s17, %s5717_s17  }
  0x13   : > { %5665 = sst [smem:[#allocation21_spill]] %s4605_s19  ;;  %s3370_s24 = sadd.s32 4294967294, %s4617_s22  }
  0x14   : > { %5666 = sst [smem:[#allocation22_spill]] %s4609_s20  ;;  %p72_p0 = scmp.ne.s32.totalorder %s4601_s18, %s4597_s17 }
  0x15   : > { %5667 = sst [smem:[#allocation23_spill]] %s4613_s21  ;;  %p5633_p1 = scmp.eq.s32.totalorder %s4724_s23, 0 }
  0x16   : > { %5668 = sst [smem:[#allocation24_spill]] %s4617_s22  ;;  %p336_p3 = scmp.eq.s32.totalorder %s3370_s24, 1 }
  0x17   : > { %p4733_p4 = por %p5633_p1, %p72_p0  ;;  %p3371_p5 = scmp.ge.s32.totalorder %s4617_s22, 1 }
  0x18   : > { %p4738_p6 = por %p336_p3, %p72_p0  ;;  %p343_p7 = scmp.lt.s32.totalorder %s4617_s22, 3 }
  0x19   : > { %s5669_s25 = scalar_select %p4733_p4, 1, 0 }
  0x1a   : > { %s5670_s26 = scalar_select %p4738_p6, 1, 0 }
  0x1b   : > { %p4743_p8 = pnand %p3371_p5, %p343_p7  ;;  %s4619_s28 = smov [#allocation8]  }
  0x1c   : > { %5671 = sst [smem:[#allocation25_spill]] %s5670_s26  ;;  %s355_s29 = sshll.u32 %s4619_s28, 4  ;;  %s4747_s29 = int_to_ptr.vmem [resolvable:$true] %s355_s29 }
  0x1d   : > { %s5672_s27 = scalar_select %p4743_p8, 1, 0 }
  0x1e   : > { %p4126_p9 = pneg %p4743_p8  ;;  %s4620_s12 = smov [#allocation11]  }
  0x1f   : > { %s387_s13 = sshll.u32 %s4620_s12, 4  ;;  %s5674_s3 = sld [smem:[#allocation30_spill]]  ;;  %s4758_s13 = int_to_ptr.vmem [resolvable:$true] %s387_s13 }
  0x20   : > { %p4754_p11 = pnand %p4126_p9, %p5633_p1 }
  0x22   : > { %s5673_s30 = scalar_select %p4754_p11, 1, 0 }
  0x23   : > { %p4768_p13 = pneg %p4754_p11 }
  0x25   : > { %s4318_s16 = scalar_lea.hbm %s5674_s3, 3072 }
  0x26   : > { %p4319_p12 = scmp.ne.s32.totalorder %s5674_s3, %s4318_s16  ;;  %p4325_p5 = scmp.lt.u32.totalorder %s4318_s16, %s5674_s3 }
  0x27   : > { %s5675_s26 = scalar_select %p4768_p13, 1, 0 }
  0x28   : > { %p4321_p0 = pnand %p4768_p13, %p4319_p12 }
  0x2a   : > { %p4322_p3 = pneg %p4321_p0 }
  0x2c   : > { %p4327_p7 = pnand %p4325_p5, %p4322_p3 }
  0x2e   : > { %4330 = shalt.err (!%p4327_p7)
}
  0x2f   : > { %s4331_s14 = scalar_lea.vmem %s4747_s29, 3072  ;;  %p4339_p2 = scmp.lt.s32.totalorder %s4747_s29, %s4747_s29 }
  0x30   : > { %p4332_p9 = scmp.ne.s32.totalorder %s4747_s29, %s4331_s14  ;;  %p4340_p6 = scmp.lt.s32.totalorder %s4331_s14, %s4331_s14 }
  0x32   : > { %p4334_p10 = pnand %p4332_p9, %p4768_p13  ;;  %p4341_p12 = por %p4340_p6, %p4339_p2 }
  0x34   : > { %p4335_p1 = pneg %p4334_p10 }
  0x36   : > { %p4342_p0 = pnand %p4341_p12, %p4335_p1 }
  0x38   : > { %4345 = shalt.err (!%p4342_p0)
}
  0x39   : > { %s5635_s15 = smov 64   ;;  %s5637_s17 = smov 4  }
  0x3a   : > { %4129 = dma.hbm_to_vmem [thread:$0]  (!%p4754_p11), %s5674_s3, 3072, %s4747_s29, [#allocation9], %s5635_s15, %s5635_s15, %s5637_s17  }
  0x3b   : > { %s5676_s7 = sld [smem:[#allocation32_spill]] }
  0x41   : > { %s4346_s14 = scalar_lea.hbm %s5676_s7, 3072 }
  0x42   : > { %p4347_p1 = scmp.ne.s32.totalorder %s5676_s7, %s4346_s14  ;;  %p4353_p10 = scmp.lt.u32.totalorder %s4346_s14, %s5676_s7 }
  0x44   : > { %p4349_p2 = pnand %p4347_p1, %p4768_p13 }
  0x46   : > { %p4350_p6 = pneg %p4349_p2 }
  0x48   : > { %p4355_p3 = pnand %p4353_p10, %p4350_p6 }
  0x4a   : > { %4358 = shalt.err (!%p4355_p3)
}
  0x4b   : > { %s4359_s29 = scalar_lea.vmem %s4758_s13, 3072  ;;  %p4367_p12 = scmp.lt.s32.totalorder %s4758_s13, %s4758_s13 }
  0x4c   : > { %p4360_p5 = scmp.ne.s32.totalorder %s4758_s13, %s4359_s29  ;;  %p4368_p0 = scmp.lt.s32.totalorder %s4359_s29, %s4359_s29 }
  0x4e   : > { %p4362_p7 = pnand %p4360_p5, %p4768_p13  ;;  %p4369_p1 = por %p4368_p0, %p4367_p12 }
  0x50   : > { %p4363_p9 = pneg %p4362_p7 }
  0x52   : > { %p4370_p2 = pnand %p4369_p1, %p4363_p9 }
  0x54   : > { %4373 = shalt.err (!%p4370_p2)
}
  0x55   : > { %4135 = dma.hbm_to_vmem [thread:$0]  (!%p4754_p11), %s5676_s7, 3072, %s4758_s13, [#allocation12], %s5635_s15, %s5635_s15, %s5637_s17  }
  0x56   : > { %s41_s11 = sadd.s32 1, %s4613_s21  ;;  %s59_s20 = sadd.s32 1, %s4605_s19 }
  0x57   : > { %p42_p6 = scmp.ge.s32.totalorder %s41_s11, 2  ;;  %p66_p10 = scmp.ne.s32.totalorder %s4605_s19, %s4601_s18 }
  0x58   : > { %p67_p3 = scmp.eq.s32.totalorder %s4617_s22, 0  ;;  %p4157_p5 = scmp.lt.s32.totalorder %s4617_s22, 2 }
  0x59   : > { %s5721_s11 = smov (%p42_p6, %s41_s11), 0  ;;  %p5678_p9 = scmp.eq.s32.totalorder %s4724_s23, 1 }
  0x5a   : > { %5677 = sst [smem:[#allocation26_spill]] %s5721_s11  ;;  %p68_p7 = por %p67_p3, %p66_p10 }
  0x5b   : > { %p4828_p12 = por %p5678_p9, %p66_p10  ;;  %s54_s24 = ssub.s32 %s4613_s21, %s5721_s11 }
  0x5c   : > { %s4835_s28 = sand.u32 1, %s4605_s19   ;;  %p57_p0 = scmp.eq.s32.totalorder %s54_s24, 0 }
  0x5d   : > { %s5679_s16 = scalar_select %p4828_p12, 1, 0 }
  0x5e   : > { %s4838_s13 = smul.u32 1536, %s4613_s21  ;;  %p4840_p1 = pnand %p4157_p5, %p68_p7 }
  0x5f   : > { %5680 = sst [smem:[#allocation27_spill]] %s5679_s16  ;;  %s443_s29 = sand.u32 1, %s4617_s22  }
  0x60   : > { %s5681_s12 = scalar_select %p4840_p1, 1, 0 }
  0x61   : > { %s4845_s14 = scalar_select %p57_p0, %s4605_s19, %s59_s20  }
  0x62   : > { %s3379_s8 = sshll.u32 %s4835_s28, 5  ;;  %s5683_s1 = sld [smem:[#allocation29_spill]] }
  0x63   : > { %5682 = sst [smem:[#allocation28_spill]] %s4845_s14  ;;  %s447_s24 = scalar_lea.vmem [#allocation5], %s3379_s8 }
  0x64   : > { %s457_s7 = sshll.u32 %s447_s24, 4  ;;  %s4857_s11 = scalar_lea.sflag [#allocation6], %s443_s29  ;;  %s4855_s7 = int_to_ptr.vmem [resolvable:$true] %s457_s7 }
  0x65   : > { %p4862_p6 = pneg %p4840_p1 }
  0x67   : > { %s5684_s20 = scalar_select %p4862_p6, 1, 0 }
  0x68   : > { %s3239_s17 = scalar_lea.hbm %s5683_s1, %s4838_s13  ;;  %s4379_s8 = scalar_lea.hbm %s5683_s1, 3072 }
  0x69   : > { %s4853_s3 = scalar_lea.hbm %s3239_s17, 512  ;;  %s4404_s21 = scalar_lea.hbm %s3239_s17, 1024 }
  0x6a   : > { %p4375_p2 = scmp.ne.s32.totalorder %s4853_s3, %s4404_s21  ;;  %p4380_p5 = scmp.lt.u32.totalorder %s4853_s3, %s5683_s1 }
  0x6b   : > { %p4381_p7 = scmp.lt.u32.totalorder %s4379_s8, %s4404_s21  ;;  %p4383_p0 = scmp.lt.u32.totalorder %s4404_s21, %s4853_s3 }
  0x6c   : > { %p4377_p10 = pnand %p4862_p6, %p4375_p2 }
  0x6d   : > { %p4382_p9 = por %p4381_p7, %p4380_p5 }
  0x6e   : > { %p4378_p3 = pneg %p4377_p10 }
  0x6f   : > { %p4384_p12 = por %p4383_p0, %p4382_p9 }
  0x71   : > { %p4385_p4 = pnand %p4384_p12, %p4378_p3 }
  0x73   : > { %4388 = shalt.err (!%p4385_p4)
}
  0x74   : > { %s4389_s17 = scalar_lea.vmem %s4855_s7, 512  ;;  %s4623_s29 = smov [#allocation5]  }
  0x75   : > { %p4390_p2 = scmp.ne.s32.totalorder %s4855_s7, %s4389_s17  ;;  %s4394_s15 = sshll.u32 %s4623_s29, 4  ;;  %s4395_s15 = int_to_ptr.vmem [resolvable:$false] %s4394_s15 }
  0x76   : > { %s4396_s14 = scalar_lea.vmem %s4395_s15, 1024  ;;  %p4397_p11 = scmp.lt.s32.totalorder %s4855_s7, %s4395_s15 }
  0x77   : > { %p4392_p10 = pnand %p4390_p2, %p4862_p6  ;;  %p4398_p13 = scmp.lt.s32.totalorder %s4396_s14, %s4389_s17 }
  0x79   : > { %p4393_p8 = pneg %p4392_p10  ;;  %p4399_p5 = por %p4398_p13, %p4397_p11 }
  0x7b   : > { %p4400_p7 = pnand %p4399_p5, %p4393_p8 }
  0x7d   : > { %4403 = shalt.err (!%p4400_p7)
}
  0x7e   : > { %s5685_s21 = smov 4   ;;  %s5686_s10 = smov 64  }
  0x7f   : > { %4145 = dma.hbm_to_vmem [thread:$0]  (!%p4840_p1), %s4853_s3, 512, %s4855_s7, %s4857_s11, %s5686_s10, %s5686_s10, %s5685_s21  }
  0x80   : > { %s4624_s8 = smov [#allocation10]   ;;  %s4625_s29 = smov [#allocation13]  }
  0x81   : > { %s371_s24 = sshll.u32 %s4624_s8, 4  ;;  %s403_s1 = sshll.u32 %s4625_s29, 4  ;;  %s372_s24 = int_to_ptr.vmem [resolvable:$true] %s371_s24  ;;  %s404_s1 = int_to_ptr.vmem [resolvable:$true] %s403_s1 }
  0x82   : > { %s4405_s14 = scalar_lea.hbm %s5624_s5, 3072  ;;  %p5687_p8 = scmp.ne.s32.totalorder %s5675_s26, 0 }
  0x83   : > { %p4406_p4 = scmp.ne.s32.totalorder %s5624_s5, %s4405_s14  ;;  %p4412_p12 = scmp.lt.u32.totalorder %s4405_s14, %s5624_s5 }
  0x85   : > { %p4408_p11 = pnand %p4406_p4, %p5687_p8 }
  0x87   : > { %p4409_p13 = pneg %p4408_p11 }
  0x89   : > { %p4414_p3 = pnand %p4412_p12, %p4409_p13 }
  0x8b   : > { %4417 = shalt.err (!%p4414_p3)
}
  0x8c   : > { %s4418_s3 = scalar_lea.vmem %s372_s24, 3072  ;;  %p4426_p10 = scmp.lt.s32.totalorder %s372_s24, %s372_s24 }
  0x8d   : > { %p4419_p9 = scmp.ne.s32.totalorder %s372_s24, %s4418_s3  ;;  %p4427_p5 = scmp.lt.s32.totalorder %s4418_s3, %s4418_s3 }
  0x8f   : > { %p4421_p0 = pnand %p4419_p9, %p5687_p8  ;;  %p4428_p7 = por %p4427_p5, %p4426_p10 }
  0x91   : > { %p4422_p2 = pneg %p4421_p0 }
  0x93   : > { %p4429_p1 = pnand %p4428_p7, %p4422_p2 }
  0x95   : > { %4432 = shalt.err (!%p4429_p1)
}
  0x96   : > { %p5688_p4 = scmp.ne.s32.totalorder %s5673_s30, 0  ;;  %s4433_s16 = scalar_lea.hbm %s5628_s9, 3072 }
  0x97   : > { %p4434_p11 = scmp.ne.s32.totalorder %s5628_s9, %s4433_s16  ;;  %p4440_p12 = scmp.lt.u32.totalorder %s4433_s16, %s5628_s9 }
  0x98   : > { %4132 = dma.hbm_to_vmem [thread:$0]  (!%p5688_p4), %s5624_s5, 3072, %s372_s24, [#allocation9], %s5686_s10, %s5686_s10, %s5685_s21  }
  0x99   : > { %p4436_p1 = pnand %p4434_p11, %p5687_p8 }
  0x9b   : > { %p4437_p13 = pneg %p4436_p1 }
  0x9d   : > { %p4442_p3 = pnand %p4440_p12, %p4437_p13 }
  0x9f   : > { %4445 = shalt.err (!%p4442_p3)
}
  0xa0   : > { %s4446_s14 = scalar_lea.vmem %s404_s1, 3072  ;;  %p4454_p10 = scmp.lt.s32.totalorder %s404_s1, %s404_s1 }
  0xa1   : > { %p4447_p9 = scmp.ne.s32.totalorder %s404_s1, %s4446_s14  ;;  %p4455_p5 = scmp.lt.s32.totalorder %s4446_s14, %s4446_s14 }
  0xa3   : > { %p4449_p0 = pnand %p4447_p9, %p5687_p8  ;;  %p4456_p7 = por %p4455_p5, %p4454_p10 }
  0xa5   : > { %p4450_p2 = pneg %p4449_p0 }
  0xa7   : > { %p4457_p6 = pnand %p4456_p7, %p4450_p2 }
  0xa9   : > { %4460 = shalt.err (!%p4457_p6)
}
  0xaa   : > { %4138 = dma.hbm_to_vmem [thread:$0]  (!%p5688_p4), %s5628_s9, 3072, %s404_s1, [#allocation12], %s5686_s10, %s5686_s10, %s5685_s21  }
  0xab   : > { %s3377_s26 = sshll.u32 %s4835_s28, 2  ;;  %s3507_s6 = sadd.s32 448, %s4838_s13 }
  0xac   : > { %s4936_s22 = scalar_lea.hbm %s5619_s0, %s3507_s6  ;;  %s424_s30 = scalar_lea.vmem [#allocation2], %s3377_s26 }
  0xad   : > { %s436_s16 = sshll.u32 %s424_s30, 4  ;;  %s4946_s1 = scalar_lea.hbm %s5621_s2, %s4838_s13  ;;  %s4940_s16 = int_to_ptr.vmem [resolvable:$true] %s436_s16 }
  0xae   : > { %s421_s21 = scalar_lea.sflag [#allocation3], %s4835_s28  ;;  %s4461_s10 = scalar_lea.hbm %s4936_s22, 64 }
  0xaf   : > { %p4462_p6 = scmp.ne.s32.totalorder %s4936_s22, %s4461_s10  ;;  %p5689_p8 = scmp.ne.s32.totalorder %s5684_s20, 0 }
  0xb0   : > { %s4466_s14 = scalar_lea.hbm %s5619_s0, 3072  ;;  %p4467_p1 = scmp.lt.u32.totalorder %s4936_s22, %s5619_s0 }
  0xb1   : > { %p4464_p4 = pnand %p4462_p6, %p5689_p8  ;;  %p4468_p13 = scmp.lt.u32.totalorder %s4466_s14, %s4461_s10 }
  0xb2   : > { %p4470_p3 = scmp.lt.u32.totalorder %s4461_s10, %s4936_s22 }
  0xb3   : > { %p4465_p11 = pneg %p4464_p4  ;;  %p4469_p12 = por %p4468_p13, %p4467_p1 }
  0xb5   : > { %p4471_p9 = por %p4470_p3, %p4469_p12 }
  0xb7   : > { %p4472_p0 = pnand %p4471_p9, %p4465_p11 }
  0xb9   : > { %4475 = shalt.err (!%p4472_p0)
}
  0xba   : > { %s4476_s13 = scalar_lea.vmem %s4940_s16, 64  ;;  %s4626_s6 = smov [#allocation2]  }
  0xbb   : > { %p4477_p2 = scmp.ne.s32.totalorder %s4940_s16, %s4476_s13  ;;  %s4481_s7 = sshll.u32 %s4626_s6, 4  ;;  %s4482_s7 = int_to_ptr.vmem [resolvable:$false] %s4481_s7 }
  0xbc   : > { %s4483_s19 = scalar_lea.vmem %s4482_s7, 128  ;;  %p4484_p7 = scmp.lt.s32.totalorder %s4940_s16, %s4482_s7 }
  0xbd   : > { %p4479_p10 = pnand %p4477_p2, %p5689_p8  ;;  %p4485_p6 = scmp.lt.s32.totalorder %s4483_s19, %s4476_s13 }
  0xbf   : > { %p4480_p5 = pneg %p4479_p10  ;;  %p4486_p4 = por %p4485_p6, %p4484_p7 }
  0xc1   : > { %p4487_p1 = pnand %p4486_p4, %p4480_p5 }
  0xc3   : > { %4490 = shalt.err (!%p4487_p1)
}
  0xc4   : > { %p5690_p11 = scmp.ne.s32.totalorder %s5681_s12, 0  ;;  %s4971_s30 = scalar_lea.hbm %s4946_s1, 1024 }
  0xc5   : > { %s471_s8 = scalar_lea.vmem [#allocation7], %s3377_s26  ;;  %s4521_s10 = scalar_lea.hbm %s4946_s1, 1088 }
  0xc6   : > { %4142 = dma.hbm_to_vmem [thread:$0]  (!%p5690_p11), %s4936_s22, 64, %s4940_s16, %s421_s21  }
  0xc7   : > { %s482_s29 = sshll.u32 %s471_s8, 4  ;;  %p4492_p13 = scmp.ne.s32.totalorder %s4971_s30, %s4521_s10  ;;  %s483_s29 = int_to_ptr.vmem [resolvable:$true] %s482_s29 }
  0xc8   : > { %s4496_s14 = scalar_lea.hbm %s5621_s2, 3072  ;;  %p4497_p9 = scmp.lt.u32.totalorder %s4971_s30, %s5621_s2 }
  0xc9   : > { %p4494_p12 = pnand %p4492_p13, %p5689_p8  ;;  %p4498_p0 = scmp.lt.u32.totalorder %s4496_s14, %s4521_s10 }
  0xca   : > { %p4500_p10 = scmp.lt.u32.totalorder %s4521_s10, %s4971_s30 }
  0xcb   : > { %p4495_p3 = pneg %p4494_p12  ;;  %p4499_p2 = por %p4498_p0, %p4497_p9 }
  0xcd   : > { %p4501_p5 = por %p4500_p10, %p4499_p2 }
  0xcf   : > { %p4502_p7 = pnand %p4501_p5, %p4495_p3 }
  0xd1   : > { %4505 = shalt.err (!%p4502_p7)
}
  0xd2   : > { %s4506_s28 = scalar_lea.vmem %s483_s29, 64  ;;  %s4627_s26 = smov [#allocation7]  }
  0xd3   : > { %p4507_p6 = scmp.ne.s32.totalorder %s483_s29, %s4506_s28  ;;  %s4511_s16 = sshll.u32 %s4627_s26, 4  ;;  %s4512_s16 = int_to_ptr.vmem [resolvable:$false] %s4511_s16 }
  0xd4   : > { %s4513_s1 = scalar_lea.vmem %s4512_s16, 128  ;;  %p4514_p13 = scmp.lt.s32.totalorder %s483_s29, %s4512_s16 }
  0xd5   : > { %p4509_p4 = pnand %p4507_p6, %p5689_p8  ;;  %p4515_p12 = scmp.lt.s32.totalorder %s4513_s1, %s4506_s28 }
  0xd7   : > { %p4510_p1 = pneg %p4509_p4  ;;  %p4516_p11 = por %p4515_p12, %p4514_p13 }
  0xd9   : > { %p4517_p0 = pnand %p4516_p11, %p4510_p1 }
  0xdb   : > { %4520 = shalt.err (!%p4517_p0)
}
  0xdc   : > { %p5691_p9 = scmp.ne.s32.totalorder %s5681_s12, 0  ;;  %p5692_p3 = scmp.ne.s32.totalorder %s5672_s27, 0 }
  0xdd   : > { %s4996_s20 = sand.u32 (!%p5692_p3), 1, %s4601_s18   ;;  %p5693_p8 = scmp.ne.s32.totalorder (!%p5692_p3), %s5669_s25, 0 }
  0xde   : > { %4148 = dma.hbm_to_vmem [thread:$0]  (!%p5691_p9), %s4971_s30, 64, %s483_s29, %s4857_s11  }
  0xdf   : > { %491 = sbr.rel (%p5692_p3) target bundleno = 1401 (0x579), region = 64  ;;  %s3384_s21 = sshll.u32 (!%p5692_p3), %s4996_s20, 2 }
  0xe0   : > { %s494_s3 = scalar_lea.sflag (!%p5692_p3), [#allocation3], %s4996_s20  ;;  %s5000_s13 = scalar_lea.vmem (!%p5692_p3), [#allocation2], %s3384_s21 }
  0xe6   : > { %4576 = dma.done.wait (%p5693_p8), %s494_s3, 64  }
  0xe7   : > { %4578 = vsyncadd (%p5693_p8), %s494_s3, 4294967232  ;;  %s502_s27 = sand.u32 1, %s4724_s23   ;;  %s3385_s11 = sshll.u32 %s4996_s20, 5 }
  0xe8   : > { %s503_s12 = scalar_lea.sflag [#allocation6], %s502_s27  ;;  %s5010_s6 = scalar_lea.vmem [#allocation5], %s3385_s11 }
  0xe9   : > { %4580 = dma.done.wait (%p5693_p8), %s503_s12, 576  }
  0xea   : > { %4582 = vsyncadd (%p5693_p8), %s503_s12, 4294966720  ;;  %s5016_s7 = scalar_lea.vmem [#allocation7], %s3384_s21  ;;  %p5694_p11 = scmp.eq.s32.totalorder %s4724_s23, 0 }
  0xec   : > { %4584 = dma.done.wait (%p5694_p11), [#allocation9], 6144   ;;  %p5695_p2 = pmov %p5694_p11 }
  0xee   : > { %4586 = vsyncadd (%p5695_p2), [#allocation9], 4294961152  ;;  %p5696_p10 = pmov %p5695_p2 }
  0xef   : > { %p5697_p5 = pmov %p5695_p2 }
  0xf0   : > { %4588 = dma.done.wait (%p5696_p10), [#allocation12], 6144  }
  0xf1   : > { %4590 = vsyncadd (%p5697_p5), [#allocation12], 4294961152  ;;  %v4628_v0 = vmov 0.0   ;;  %vm4629_vm0 = vmmov 0   ;;  %v4222_v1 = vld [vmem:[#allocation8 + $0x40] sm:$0xff]   ;;  %v4224_v3 = vld [vmem:[#allocation8 + $0x48] sm:$0xff]  }
  0xf2   : > { %3689 = vmatprep.subr.bf16.mxu0 %v4628_v0  ;;  %3725 = vmatprep.subr.bf16.mxu1 %v4628_v0  ;;  %v4223_v2 = vld [vmem:[#allocation8] sm:$0xff]   ;;  %v4225_v4 = vld [vmem:[#allocation8 + $0x8] sm:$0xff]   ;;  %v4226_v5 = vld [vmem:[#allocation8 + $0x50] sm:$0xff]   ;;  %vm622_vm1 = vcmask 1045504   ;;  %vm720_vm6 = vsmask.f32 7424 }
  0xf3   : > { %3705 = vmatprep.mubr.msk.bf16.mxu0 %vm4629_vm0, %v4628_v0  ;;  %3741 = vmatprep.mubr.msk.bf16.mxu1 %vm4629_vm0, %v4628_v0  ;;  %v4227_v6 = vld [vmem:[#allocation8 + $0x10] sm:$0xff]   ;;  %v4228_v7 = vld [vmem:[#allocation8 + $0x58] sm:$0xff]   ;;  %v4230_v9 = vld [vmem:[#allocation8 + $0x60] sm:$0xff]   ;;  %vm1029_vm13 = vcmask 1046528   ;;  %s5698_s8 = sld [smem:[#allocation31_spill]]  ;;  %s5699_s15 = sld [smem:[#allocation33_spill]] }
  0xf4   : > { %3690 = vmatpush3.bf16.msra.mxu0 %v4222_v1  ;;  %3726 = vmatpush3.bf16.msra.mxu1 %v4223_v2  ;;  %v4229_v8 = vld [vmem:[#allocation8 + $0x18] sm:$0xff]   ;;  %v4231_v10 = vld [vmem:[#allocation8 + $0x20] sm:$0xff]   ;;  %v591_v11 = vld [vmem:[%s5000_s13] sm:$0xf]  ;;  %s5700_s24 = sld [smem:[#allocation34_spill]]  ;;  %s5703_s22 = sld [smem:[#allocation22_spill]] }
  0xf5   : > { %3691 = vmatprep.subr.bf16.mxu0 %v4628_v0  ;;  %3727 = vmatprep.subr.bf16.mxu1 %v4628_v0  ;;  %v3518_v12 = vld [vmem:[%s5010_s6] sm:$0xff]   ;;  %v3533_v13 = vld [vmem:[%s5010_s6 + $0x8] sm:$0xff]   ;;  %v4232_v18 = vld [vmem:[#allocation8 + $0x68] sm:$0xff]   ;;  %v601_v19 = vunpack.c.l.bf16 %v591_v11  ;;  %s5528_s28 = scalar_lea.vmem [#allocation14], %s3385_s11  ;;  %s5704_s21 = sld [smem:[#allocation35_spill]] }
  0xf6   : > { %v3519_v14 = vunpack.c.l.bf16 %v3518_v12  ;;  %v3520_v15 = vunpack.c.h.bf16 %v3518_v12  ;;  %v3523_v16 = vunpack.c.l.bf16 %v3533_v13  ;;  %v3524_v17 = vunpack.c.h.bf16 %v3533_v13  ;;  %v4233_v20 = vld [vmem:[#allocation8 + $0x28] sm:$0xff]   ;;  %v3535_v29 = vld [vmem:[%s5010_s6 + $0x18] sm:$0xff]   ;;  %v4236_v44 = vld [vmem:[#allocation8 + $0x78] sm:$0xff]   ;;  %s3193_s27 = sshll.u32 %s5528_s28, 4  ;;  %s5706_s11 = sld [smem:[#allocation27_spill]]  ;;  %s5560_s27 = int_to_ptr.vmem [resolvable:$true] %s3193_s27 }
  0xf7   : > { %v3534_v25 = vld [vmem:[%s5010_s6 + $0x10] sm:$0xff]   ;;  %v612_v26 = vrot.slane %v601_v19, 2  ;;  %v4234_v30 = vld [vmem:[#allocation8 + $0x70] sm:$0xff]   ;;  %v3531_v34 = vunpack.c.l.bf16 %v3535_v29  ;;  %v3532_v43 = vunpack.c.h.bf16 %v3535_v29  ;;  %v4237_v45 = vld [vmem:[#allocation8 + $0x38] sm:$0xff]   ;;  %s3177_s6 = scalar_lea.sflag [#allocation4], %s4996_s20  ;;  %s4630_s23 = smov [#allocation14]  }
  0xf8   : > { %3692 = vmatpush3.bf16.msra.mxu0 %v4224_v3  ;;  %3728 = vmatpush3.bf16.msra.mxu1 %v4225_v4  ;;  %v623_v21 = vrot.slane %v3519_v14, 2  ;;  %v624_v22 = vrot.slane %v3520_v15, 2  ;;  %v626_v23 = vrot.slane %v3523_v16, 2  ;;  %v628_v24 = vrot.slane %v3524_v17, 2  ;;  %v4235_v35 = vld [vmem:[#allocation8 + $0x30] sm:$0xff]   ;;  %v4239_v17 = vld [vmem:[#allocation8 + $0x88] sm:$0xff]  }
  0xf9   : > { %3693 = vmatprep.subr.bf16.mxu0 %v4628_v0  ;;  %3729 = vmatprep.subr.bf16.mxu1 %v4628_v0  ;;  %v3527_v27 = vunpack.c.l.bf16 %v3534_v25  ;;  %v3528_v28 = vunpack.c.h.bf16 %v3534_v25  ;;  %v634_v49 = vrot.slane %v3531_v34, 2  ;;  %v600_v54 = vld [vmem:[%s5016_s7] sm:$0xf]  ;;  %v636_v1 = vrot.slane %v3532_v43, 2  ;;  %s4522_s7 = scalar_lea.vmem %s5560_s27, 512  ;;  %s4526_s25 = sshll.u32 %s4630_s23, 4  ;;  %s4527_s25 = int_to_ptr.vmem [resolvable:$false] %s4526_s25 }
  0xfa   : > { %v5048_v31 = vsel %vm622_vm1, %v623_v21, %v624_v22  ;;  %v5051_v32 = vsel %vm622_vm1, %v624_v22, %v626_v23  ;;  %v5054_v33 = vsel %vm622_vm1, %v626_v23, %v628_v24  ;;  %v5057_v36 = vsel %vm622_vm1, %v612_v26, %v623_v21  ;;  %s3503_s26 = smul.u32 1536, %s5703_s22  ;;  %p4523_p7 = scmp.ne.s32.totalorder %s5560_s27, %s4522_s7 }
  0xfb   : > { %vm653_vm2 = vcmp.ge.f32.partialorder %v5048_v31, 0.0  ;;  %vm654_vm3 = vcmp.ge.f32.partialorder %v5051_v32, 0.0  ;;  %vm655_vm4 = vcmp.ge.f32.partialorder %v5054_v33, 0.0  ;;  %vm652_vm5 = vcmp.ge.f32.partialorder %v5057_v36, 0.0  ;;  %s5705_s3 = smov %s5704_s21  ;;  %s4528_s19 = scalar_lea.vmem %s4527_s25, 1024 }
  0xfc   : > { %3694 = vmatpush3.bf16.msra.mxu0 %v4226_v5  ;;  %3730 = vmatpush3.bf16.msra.mxu1 %v4227_v6  ;;  %v662_v37 = vmul.f32 0.1, %v5057_v36  ;;  %v663_v38 = vmul.f32 0.1, %v5048_v31  ;;  %v630_v39 = vrot.slane %v3527_v27, 2  ;;  %v632_v42 = vrot.slane %v3528_v28, 2  ;;  %s5549_s13 = scalar_lea.hbm %s5704_s21, %s3503_s26  ;;  %p4529_p13 = scmp.lt.s32.totalorder %s5560_s27, %s4527_s25 }
  0xfd   : > { %3695 = vmatprep.subr.bf16.mxu0 %v4628_v0  ;;  %3731 = vmatprep.subr.bf16.mxu1 %v4628_v0  ;;  %v664_v40 = vmul.f32 0.1, %v5051_v32  ;;  %v665_v41 = vmul.f32 0.1, %v5054_v33  ;;  %s5558_s12 = scalar_lea.hbm %s5549_s13, 512  ;;  %p5707_p6 = scmp.ne.s32.totalorder %s5706_s11, 0 }
  0xfe   : > { %v672_v46 = vsel %vm652_vm5, %v5057_v36, %v662_v37  ;;  %v673_v47 = vsel %vm653_vm2, %v5048_v31, %v663_v38  ;;  %v5074_v48 = vsel %vm622_vm1, %v628_v24, %v630_v39  ;;  %v5085_v53 = vsel %vm622_vm1, %v630_v39, %v632_v42  ;;  %v4240_v24 = vld [vmem:[#allocation8 + $0x90] sm:$0xff]   ;;  %p4530_p12 = scmp.lt.s32.totalorder %s4528_s19, %s4522_s7 }
  0xff   : > { %v674_v50 = vsel %vm654_vm3, %v5051_v32, %v664_v40  ;;  %v675_v51 = vsel %vm655_vm4, %v5054_v33, %v665_v41  ;;  %v5082_v52 = vpack.c.bf16 %v673_v47, %v672_v46  ;;  %vm656_vm7 = vcmp.ge.f32.partialorder %v5074_v48, 0.0  ;;  %v4241_v40 = vld [vmem:[#allocation8 + $0x98] sm:$0xff]   ;;  %v4243_v47 = vld [vmem:[#allocation8 + $0xa8] sm:$0xff]   ;;  %p4524_p4 = pnand %p4523_p7, %p5707_p6 }
 0x100   : > { %3696 = vmatpush3.bf16.msra.mxu0 %v4228_v7  ;;  %3732 = vmatpush3.bf16.msra.mxu1 %v4229_v8  ;;  %v5089_v55 = vpack.c.bf16 %v675_v51, %v674_v50  ;;  %vm657_vm8 = vcmp.ge.f32.partialorder %v5085_v53, 0.0  ;;  %v666_v56 = vmul.f32 0.1, %v5074_v48  ;;  %v667_v59 = vmul.f32 0.1, %v5085_v53  ;;  %v4244_v50 = vld [vmem:[#allocation8 + $0xb0] sm:$0xff]   ;;  %p4531_p0 = por %p4530_p12, %p4529_p13 }
 0x101   : > { %3697 = vmatprep.subr.bf16.mxu0 %v4628_v0  ;;  %3733 = vmatprep.subr.bf16.mxu1 %v4628_v0  ;;  %v722_v57 = vshrl.u32 %v5082_v52, 16  ;;  %v724_v58 = vshll.u32 %v5082_v52, 16  ;;  %v5099_v60 = vsel %vm622_vm1, %v632_v42, %v634_v49  ;;  %v5111_v7 = vsel %vm622_vm1, %v634_v49, %v636_v1  ;;  %p4525_p1 = pneg %p4524_p4 }
 0x102   : > { %v729_v61 = vshll.u32 %v5089_v55, 16  ;;  %v676_v62 = vsel %vm656_vm7, %v5074_v48, %v666_v56  ;;  %v733_v63 = vshrl.u32 %v5089_v55, 16  ;;  %v677_v3 = vsel %vm657_vm8, %v5085_v53, %v667_v59 }
 0x103   : > { %v726_v2 = vrot.slane %v724_v58, 1  ;;  %vm658_vm9 = vcmp.ge.f32.partialorder %v5099_v60, 0.0  ;;  %v668_v4 = vmul.f32 0.1, %v5099_v60  ;;  %v5108_v6 = vpack.c.bf16 %v677_v3, %v676_v62  ;;  %v4246_v62 = vld [vmem:[#allocation10] sm:$0xff]   ;;  %v4250_v3 = vld [vmem:[#allocation10 + $0x48] sm:$0xff]   ;;  %p4532_p9 = pnand %p4531_p0, %p4525_p1 }
 0x104   : > { %3698 = vmatpush3.bf16.msra.mxu0 %v4230_v9  ;;  %3734 = vmatpush3.bf16.msra.mxu1 %v4231_v10  ;;  %v731_v5 = vrot.slane %v729_v61, 1  ;;  %v610_v8 = vunpack.c.l.bf16 %v600_v54  ;;  %v4238_v10 = vld [vmem:[#allocation8 + $0x80] sm:$0xff]   ;;  %vm659_vm10 = vcmp.ge.f32.partialorder %v5111_v7, 0.0  ;;  %v669_v11 = vmul.f32 0.1, %v5111_v7 }
 0x105   : > { %3699 = vmatprep.subr.bf16.mxu0 %v4628_v0  ;;  %3735 = vmatprep.subr.bf16.mxu1 %v4628_v0  ;;  %v727_v9 = vor.u32 %v726_v2, %v722_v57  ;;  %v678_v12 = vsel %vm658_vm9, %v5099_v60, %v668_v4  ;;  %v737_v13 = vshll.u32 %v5108_v6, 16  ;;  %v741_v25 = vshrl.u32 %v5108_v6, 16  ;;  %v4249_v2 = vld [vmem:[#allocation10 + $0x10] sm:$0xff]   ;;  %v4251_v4 = vld [vmem:[#allocation10 + $0x18] sm:$0xff]  }
 0x106   : > { %v5118_v14 = vrot.slane %v610_v8, 2  ;;  %v679_v16 = vsel %vm659_vm10, %v5111_v7, %v669_v11  ;;  %v1031_v34 = vrot.slane %v5089_v55, 1  ;;  %v1033_v41 = vrot.slane %v5108_v6, 1  ;;  %v4255_v8 = vld [vmem:[#allocation10 + $0x28] sm:$0xff]   ;;  %v4258_v11 = vld [vmem:[#allocation10 + $0x38] sm:$0xff]  }
 0x107   : > { %v732_v15 = vsel %vm720_vm6, %v727_v9, %v731_v5  ;;  %v5125_v19 = vpack.c.bf16 %v679_v16, %v678_v12  ;;  %v739_v21 = vrot.slane %v737_v13, 1  ;;  %v4256_v9 = vld [vmem:[#allocation10 + $0x30] sm:$0xff]   ;;  %v4257_v12 = vld [vmem:[#allocation10 + $0x60] sm:$0xff]   ;;  %v4259_v13 = vld [vmem:[#allocation10 + $0x68] sm:$0xff]  }
 0x108   : > { %3700 = vmatpush3.bf16.msra.mxu0 %v4232_v18  ;;  %3736 = vmatpush3.bf16.msra.mxu1 %v4233_v20  ;;  %v735_v18 = vor.u32 %v733_v63, %v731_v5  ;;  %v5129_v20 = vsel %vm622_vm1, %v636_v1, %v5118_v14  ;;  %vm661_vm11 = vcmp.ge.f32.partialorder %v5118_v14, 0.0  ;;  %v671_v23 = vmul.f32 0.1, %v5118_v14  ;;  %v4247_v63 = vld [vmem:[#allocation10 + $0x8] sm:$0xff]   ;;  %v4248_v1 = vld [vmem:[#allocation10 + $0x40] sm:$0xff]   ;;  %v4252_v5 = vld [vmem:[#allocation10 + $0x50] sm:$0xff]  }
 0x109   : > { %3701 = vmatprep.subr.bf16.mxu0 %v4628_v0  ;;  %3737 = vmatprep.subr.bf16.mxu1 %v4628_v0  ;;  %vm660_vm12 = vcmp.ge.f32.partialorder %v5129_v20, 0.0  ;;  %v670_v22 = vmul.f32 0.1, %v5129_v20  ;;  %v745_v26 = vshll.u32 %v5125_v19, 16  ;;  %v749_v37 = vshrl.u32 %v5125_v19, 16  ;;  %v4261_v16 = vld [vmem:[#allocation10 + $0x78] sm:$0xff]  }
 0x10a   : > { %v681_v28 = vsel %vm661_vm11, %v5118_v14, %v671_v23  ;;  %v1034_v56 = vsel %vm1029_vm13, %v1031_v34, %v1033_v41  ;;  %v1035_v57 = vrot.slane %v5125_v19, 1 }
 0x10b   : > { %v680_v27 = vsel %vm660_vm12, %v5129_v20, %v670_v22  ;;  %v747_v39 = vrot.slane %v745_v26, 1  ;;  %vm1817_vm12 = vcmask 1041408  }
 0x10c   : > { %3702 = vmatpush3.bf16.msra.mxu0 %v4234_v30  ;;  %3738 = vmatpush3.bf16.msra.mxu1 %v4235_v35  ;;  %v5142_v29 = vpack.c.bf16 %v681_v28, %v680_v27  ;;  %v1030_v30 = vrot.slane %v5082_v52, 1  ;;  %v740_v35 = vsel %vm720_vm6, %v735_v18, %v739_v21  ;;  %v1036_v58 = vsel %vm1029_vm13, %v1033_v41, %v1035_v57 }
 0x10d   : > { %3703 = vmatprep.subr.bf16.mxu0 %v4628_v0  ;;  %3739 = vmatprep.subr.bf16.mxu1 %v4628_v0  ;;  %v751_v49 = vor.u32 %v749_v37, %v747_v39 }
 0x10e   : > { %v753_v38 = vshll.u32 %v5142_v29, 16  ;;  %v757_v43 = vshrl.u32 %v5142_v29, 16  ;;  %v1037_v59 = vrot.slane %v5142_v29, 1 }
 0x110   : > { %3704 = vmatpush3.bf16.msra.mxu0 %v4236_v44  ;;  %3740 = vmatpush3.bf16.msra.mxu1 %v4237_v45  ;;  %v755_v42 = vrot.slane %v753_v38, 1  ;;  %v743_v44 = vor.u32 %v741_v25, %v739_v21  ;;  %v4242_v45 = vld [vmem:[#allocation8 + $0xa0] sm:$0xff]   ;;  %v1038_v61 = vsel %vm1029_vm13, %v1035_v57, %v1037_v59 }
 0x111   : > { %3761 = vmatprep.subr.bf16.mxu0 %v4628_v0  ;;  %3797 = vmatprep.subr.bf16.mxu1 %v4628_v0 }
 0x112   : > { %v748_v46 = vsel %vm720_vm6, %v743_v44, %v747_v39  ;;  %v756_v51 = vsel %vm720_vm6, %v751_v49, %v755_v42  ;;  %v759_v54 = vor.u32 %v757_v43, %v755_v42 }
 0x113   : > { %3742 = vmatmul.mubr.bf16.vlgmr.msra.gmra.mrb[0].mxu1 %v5082_v52  ;;  %3706 = vmatmul.mubr.bf16.vlgmr.msra.gmra.mrb[0].mxu0 %v732_v15  ;;  %v4245_v52 = vld [vmem:[#allocation8 + $0xb8] sm:$0xff]   ;;  %v4260_v15 = vld [vmem:[#allocation10 + $0x70] sm:$0xff]  }
 0x114   : > { %3745 = vmatprep.mubr.msk.bf16.mxu1 %vm4629_vm0, %v4628_v0  ;;  %3762 = vmatpush3.bf16.msra.mxu0 %v4238_v10  ;;  %v4254_v10 = vld [vmem:[#allocation10 + $0x58] sm:$0xff]  }
 0x115   : > { %3709 = vmatprep.mubr.msk.bf16.mxu0 %vm4629_vm0, %v4628_v0  ;;  %3763 = vmatprep.subr.bf16.mxu0 %v4628_v0 }
 0x116   : > { %3798 = vmatpush3.bf16.msra.mxu1 %v4248_v1 }
 0x117   : > { %3799 = vmatprep.subr.bf16.mxu1 %v4628_v0 }
 0x118   : > { %3764 = vmatpush3.bf16.msra.mxu0 %v4239_v17 }
 0x119   : > { %3765 = vmatprep.subr.bf16.mxu0 %v4628_v0 }
 0x11a   : > { %3800 = vmatpush3.bf16.msra.mxu1 %v4250_v3 }
 0x11b   : > { %3746 = vmatmul.mubr.bf16.gmra.mrb[4].mxu1 %v5089_v55  ;;  %3710 = vmatmul.mubr.bf16.gmra.mrb[4].mxu0 %v740_v35  ;;  %v1032_v55 = vsel %vm1029_vm13, %v1030_v30, %v1031_v34 }
 0x11c   : > { %3749 = vmatprep.mubr.msk.bf16.mxu1 %vm4629_vm0, %v4628_v0  ;;  %3766 = vmatpush3.bf16.msra.mxu0 %v4240_v24 }
 0x11d   : > { %3713 = vmatprep.mubr.msk.bf16.mxu0 %vm4629_vm0, %v4628_v0  ;;  %3767 = vmatprep.subr.bf16.mxu0 %v4628_v0 }
 0x11e   : > { %3801 = vmatprep.subr.bf16.mxu1 %v4628_v0 }
 0x11f   : > { %3802 = vmatpush3.bf16.msra.mxu1 %v4252_v5 }
 0x120   : > { %3768 = vmatpush3.bf16.msra.mxu0 %v4241_v40  ;;  %3803 = vmatprep.subr.bf16.mxu1 %v4628_v0 }
 0x121   : > { %3769 = vmatprep.subr.bf16.mxu0 %v4628_v0 }
 0x123   : > { %3750 = vmatmul.mubr.bf16.gmra.mrb[8].mxu1 %v5108_v6  ;;  %3714 = vmatmul.mubr.bf16.gmra.mrb[8].mxu0 %v748_v46  ;;  %v4253_v6 = vld [vmem:[#allocation10 + $0x20] sm:$0xff]  }
 0x124   : > { %3753 = vmatprep.mubr.msk.bf16.mxu1 %vm4629_vm0, %v4628_v0  ;;  %3770 = vmatpush3.bf16.msra.mxu0 %v4242_v45 }
 0x125   : > { %3717 = vmatprep.mubr.msk.bf16.mxu0 %vm4629_vm0, %v4628_v0  ;;  %3771 = vmatprep.subr.bf16.mxu0 %v4628_v0 }
 0x126   : > { %3804 = vmatpush3.bf16.msra.mxu1 %v4254_v10 }
 0x127   : > { %3805 = vmatprep.subr.bf16.mxu1 %v4628_v0 }
 0x128   : > { %3772 = vmatpush3.bf16.msra.mxu0 %v4243_v47 }
 0x129   : > { %3773 = vmatprep.subr.bf16.mxu0 %v4628_v0 }
 0x12a   : > { %3806 = vmatpush3.bf16.msra.mxu1 %v4257_v12 }
 0x12b   : > { %3754 = vmatmul.mubr.bf16.gmra.mrb[12].mxu1 %v5125_v19  ;;  %3718 = vmatmul.mubr.bf16.gmra.mrb[12].mxu0 %v756_v51 }
 0x12c   : > { %3757 = vmatprep.mubr.msk.bf16.mxu1 %vm4629_vm0, %v4628_v0  ;;  %3721 = vmatprep.mubr.msk.bf16.mxu0 %vm4629_vm0, %v4628_v0 }
 0x12d   : > { %3774 = vmatpush3.bf16.msra.mxu0 %v4244_v50  ;;  %3807 = vmatprep.subr.bf16.mxu1 %v4628_v0 }
 0x12e   : > { %3775 = vmatprep.subr.bf16.mxu0 %v4628_v0  ;;  %3808 = vmatpush3.bf16.msra.mxu1 %v4259_v13 }
 0x12f   : > { %3809 = vmatprep.subr.bf16.mxu1 %v4628_v0 }
 0x131   : > { %3776 = vmatpush3.bf16.msra.mxu0 %v4245_v52 }
 0x132   : > { %3833 = vmatprep.subr.bf16.mxu0 %v4628_v0  ;;  %3810 = vmatpush3.bf16.msra.mxu1 %v4260_v15 }
 0x133   : > { %3758 = vmatmul.mubr.bf16.gmra.mrb[16].mxu1 %v5142_v29  ;;  %3722 = vmatmul.mubr.bf16.gmra.mrb[16].mxu0 %v759_v54 }
 0x134   : > { %3813 = vmatprep.mubr.msk.bf16.mxu1 %vm4629_vm0, %v4628_v0  ;;  %3777 = vmatprep.mubr.msk.bf16.mxu0 %vm4629_vm0, %v4628_v0 }
 0x135   : > { %3811 = vmatprep.subr.bf16.mxu1 %v4628_v0 }
 0x136   : > { %3812 = vmatpush3.bf16.msra.mxu1 %v4261_v16 }
 0x137   : > { %3869 = vmatprep.subr.bf16.mxu1 %v4628_v0 }
 0x13b   : > { %3778 = vmatmul.mubr.bf16.vlgmr.msra.gmra.mrb[20].mxu0 %v1032_v55 }
 0x13c   : > { %3781 = vmatprep.mubr.msk.bf16.mxu0 %vm4629_vm0, %v4628_v0  ;;  %3834 = vmatpush3.bf16.msra.mxu0 %v4246_v62 }
 0x13d   : > { %3835 = vmatprep.subr.bf16.mxu0 %v4628_v0 }
 0x140   : > { %3836 = vmatpush3.bf16.msra.mxu0 %v4247_v63 }
 0x141   : > { %3837 = vmatprep.subr.bf16.mxu0 %v4628_v0 }
 0x143   : > { %3782 = vmatmul.mubr.bf16.gmra.mrb[24].mxu0 %v1034_v56 }
 0x144   : > { %3785 = vmatprep.mubr.msk.bf16.mxu0 %vm4629_vm0, %v4628_v0  ;;  %3838 = vmatpush3.bf16.msra.mxu0 %v4249_v2  ;;  %v1193_v2 = vlaneseq }
 0x145   : > { %3839 = vmatprep.subr.bf16.mxu0 %v4628_v0 }
 0x148   : > { %3840 = vmatpush3.bf16.msra.mxu0 %v4251_v4 }
 0x149   : > { %3841 = vmatprep.subr.bf16.mxu0 %v4628_v0 }
 0x14b   : > { %3786 = vmatmul.mubr.bf16.gmra.mrb[28].mxu0 %v1036_v58 }
 0x14c   : > { %3789 = vmatprep.mubr.msk.bf16.mxu0 %vm4629_vm0, %v4628_v0  ;;  %3842 = vmatpush3.bf16.msra.mxu0 %v4253_v6 }
 0x14d   : > { %3843 = vmatprep.subr.bf16.mxu0 %v4628_v0 }
 0x150   : > { %3844 = vmatpush3.bf16.msra.mxu0 %v4255_v8 }
 0x151   : > { %3845 = vmatprep.subr.bf16.mxu0 %v4628_v0 }
 0x153   : > { %3790 = vmatmul.mubr.bf16.gmra.mrb[32].mxu0 %v1038_v61 }
 0x154   : > { %3793 = vmatprep.mubr.msk.bf16.mxu0 %vm4629_vm0, %v4628_v0  ;;  %3846 = vmatpush3.bf16.msra.mxu0 %v4256_v9 }
 0x155   : > { %3847 = vmatprep.subr.bf16.mxu0 %v4628_v0 }
 0x158   : > { %3848 = vmatpush3.bf16.msra.mxu0 %v4258_v11  ;;  %v5222_v11 = vshrl.u32 %v1193_v2, 7 }
 0x159   : > { %3905 = vmatprep.subr.bf16.mxu0 %v4628_v0 }
 0x15a   : > { %v1205_v15 = vadd.s32 4294967291, %v5222_v11 }
 0x15b   : > { %3794 = vmatmul.mubr.bf16.gmra.mrb[36].mxu0 %v1037_v59 }
 0x15c   : > { %3849 = vmatprep.mubr.msk.bf16.mxu0 %vm4629_vm0, %v4628_v0  ;;  %vm1215_vm14 = vcmp.ge.s32.totalorder %v1205_v15, 0 }
 0x1e6   : > { %v968_v17 = vpop.f32.mrb[0].mxu1  ;;  %v847_v18 = vpop.f32.mrb[0].mxu0 }
 0x1e7   : > { %v3743_v19 = vpop.f32.mrb[1].mxu1  ;;  %v969_v21 = vadd.f32 %v968_v17, %v847_v18  ;;  %v3707_v22 = vpop.f32.mrb[1].mxu0  ;;  %v5228_v17 = vld [vmem:[%s5623_s4] ss:$0 sm:$0xff] }
 0x1e8   : > { %v971_v23 = vpop.f32.mrb[2].mxu1  ;;  %v850_v24 = vpop.f32.mrb[2].mxu0 }
 0x1e9   : > { %v3744_v25 = vpop.f32.mrb[3].mxu1  ;;  %v972_v26 = vadd.f32 %v971_v23, %v850_v24  ;;  %v3708_v27 = vpop.f32.mrb[3].mxu0 }
 0x1ee   : > { %v976_v28 = vpop.f32.mrb[4].mxu1  ;;  %v855_v29 = vpop.f32.mrb[4].mxu0 }
 0x1ef   : > { %v3747_v30 = vpop.f32.mrb[5].mxu1  ;;  %v977_v34 = vadd.f32 %v976_v28, %v855_v29  ;;  %v3711_v35 = vpop.f32.mrb[5].mxu0 }
 0x1f0   : > { %v979_v37 = vpop.f32.mrb[6].mxu1  ;;  %v858_v38 = vpop.f32.mrb[6].mxu0 }
 0x1f1   : > { %v3748_v39 = vpop.f32.mrb[7].mxu1  ;;  %v980_v40 = vadd.f32 %v979_v37, %v858_v38  ;;  %v3712_v41 = vpop.f32.mrb[7].mxu0 }
 0x1f6   : > { %v984_v42 = vpop.f32.mrb[8].mxu1  ;;  %v863_v43 = vpop.f32.mrb[8].mxu0 }
 0x1f7   : > { %v3751_v44 = vpop.f32.mrb[9].mxu1  ;;  %v5212_v45 = vadd.f32 %v984_v42, %v863_v43  ;;  %v3715_v46 = vpop.f32.mrb[9].mxu0 }
 0x1f8   : > { %v987_v47 = vpop.f32.mrb[10].mxu1  ;;  %v866_v49 = vpop.f32.mrb[10].mxu0 }
 0x1f9   : > { %v3752_v50 = vpop.f32.mrb[11].mxu1  ;;  %v5214_v51 = vadd.f32 %v987_v47, %v866_v49  ;;  %v3716_v52 = vpop.f32.mrb[11].mxu0 }
 0x1fe   : > { %v992_v54 = vpop.f32.mrb[12].mxu1  ;;  %v871_v55 = vpop.f32.mrb[12].mxu0 }
 0x1ff   : > { %v3755_v56 = vpop.f32.mrb[13].mxu1  ;;  %v5216_v57 = vadd.f32 %v992_v54, %v871_v55  ;;  %v3719_v58 = vpop.f32.mrb[13].mxu0 }
 0x200   : > { %v995_v59 = vpop.f32.mrb[14].mxu1  ;;  %v874_v61 = vpop.f32.mrb[14].mxu0 }
 0x201   : > { %v3756_v62 = vpop.f32.mrb[15].mxu1  ;;  %v5218_v63 = vadd.f32 %v995_v59, %v874_v61  ;;  %v3720_v1 = vpop.f32.mrb[15].mxu0 }
 0x206   : > { %v1000_v3 = vpop.f32.mrb[16].mxu1  ;;  %v879_v4 = vpop.f32.mrb[16].mxu0 }
 0x207   : > { %v3759_v5 = vpop.f32.mrb[17].mxu1  ;;  %v3723_v6 = vpop.f32.mrb[17].mxu0  ;;  %v5220_v8 = vadd.f32 %v1000_v3, %v879_v4 }
 0x208   : > { %v1003_v9 = vpop.f32.mrb[18].mxu1  ;;  %v882_v10 = vpop.f32.mrb[18].mxu0 }
 0x209   : > { %v3760_v12 = vpop.f32.mrb[19].mxu1  ;;  %v3724_v13 = vpop.f32.mrb[19].mxu0 }
 0x20a   : > { %v4262_v12 = vld [vmem:[#allocation10 + $0x80] sm:$0xff]  }
 0x20e   : > { %v1126_v16 = vpop.f32.mrb[20].mxu0 }
 0x20f   : > { %v1165_v18 = vadd.f32 %v1126_v16, %v969_v21  ;;  %v3779_v19 = vpop.f32.mrb[21].mxu0 }
 0x210   : > { %v1129_v22 = vpop.f32.mrb[22].mxu0 }
 0x211   : > { %v1182_v23 = vadd.f32 %v5228_v17, %v1165_v18  ;;  %v1166_v24 = vadd.f32 %v1129_v22, %v972_v26  ;;  %v3780_v25 = vpop.f32.mrb[23].mxu0 }
 0x213   : > { %v1265_v27 = vsel %vm1215_vm14, %v1182_v23, 0.0  ;;  %v1183_v28 = vadd.f32 %v5228_v17, %v1166_v24  ;;  %v5248_v24 = vadd.s32 64, %v5222_v11 }
 0x214   : > { %vm1275_vm15 = vcmp.ge.f32.partialorder %v1265_v27, 0.0  ;;  %v1285_v29 = vmul.f32 0.1, %v1265_v27 }
 0x215   : > { %vm1276_vm2 = vcmp.ge.f32.partialorder %v1183_v28, 0.0  ;;  %v1286_v30 = vmul.f32 0.1, %v1183_v28 }
 0x216   : > { %v1295_v35 = vsel %vm1275_vm15, %v1265_v27, %v1285_v29  ;;  %v1134_v37 = vpop.f32.mrb[24].mxu0 }
 0x217   : > { %v1296_v38 = vsel %vm1276_vm2, %v1183_v28, %v1286_v30  ;;  %v1167_v39 = vadd.f32 %v1134_v37, %v977_v34  ;;  %v3783_v41 = vpop.f32.mrb[25].mxu0  ;;  %v4263_v28 = vld [vmem:[#allocation10 + $0x88] sm:$0xff]  }
 0x218   : > { %v1305_v21 = vpack.c.bf16 %v1296_v38, %v1295_v35  ;;  %v1137_v42 = vpop.f32.mrb[26].mxu0 }
 0x219   : > { %v1184_v43 = vadd.f32 %v5228_v17, %v1167_v39  ;;  %v1168_v44 = vadd.f32 %v1137_v42, %v980_v40  ;;  %v3784_v46 = vpop.f32.mrb[27].mxu0 }
 0x21a   : > { %3850 = vmatmul.mubr.bf16.vlgmr.msra.gmra.mrb[40].mxu0 %v1305_v21  ;;  %v1346_v49 = vshll.u32 %v1305_v21, 16  ;;  %v1344_v2 = vshrl.u32 %v1305_v21, 16  ;;  %v1649_v4 = vrot.slane %v1305_v21, 1  ;;  %v1213_v21 = vadd.s32 4294967291, %v5248_v24 }
 0x21b   : > { %v1287_v26 = vmul.f32 0.1, %v1184_v43  ;;  %v1185_v47 = vadd.f32 %v5228_v17, %v1168_v44  ;;  %3853 = vmatprep.mubr.msk.bf16.mxu0 %vm4629_vm0, %v4628_v0  ;;  %vm1277_vm3 = vcmp.ge.f32.partialorder %v1184_v43, 0.0 }
 0x21c   : > { %v1348_v59 = vrot.slane %v1346_v49, 1  ;;  %vm1233_vm10 = vcmp.lt.s32.totalorder %v1213_v21, 64  ;;  %v4279_v21 = vld [vmem:[#allocation11 + $0x58] sm:$0xff]  }
 0x21d   : > { %vm1278_vm4 = vcmp.ge.f32.partialorder %v1185_v47, 0.0  ;;  %v1288_v50 = vmul.f32 0.1, %v1185_v47  ;;  %v1297_v34 = vsel %vm1277_vm3, %v1184_v43, %v1287_v26 }
 0x21e   : > { %v1142_v52 = vpop.f32.mrb[28].mxu0 }
 0x21f   : > { %v1298_v54 = vsel %vm1278_vm4, %v1185_v47, %v1288_v50  ;;  %v1169_v55 = vadd.f32 %v1142_v52, %v5212_v45  ;;  %v3787_v56 = vpop.f32.mrb[29].mxu0  ;;  %v1349_v45 = vor.u32 %v1348_v59, %v1344_v2 }
 0x220   : > { %v1145_v58 = vpop.f32.mrb[30].mxu0  ;;  %v1306_v40 = vpack.c.bf16 %v1298_v54, %v1297_v34  ;;  %v4265_v56 = vld [vmem:[#allocation10 + $0x98] sm:$0xff]  }
 0x221   : > { %v1186_v61 = vadd.f32 %v5228_v17, %v1169_v55  ;;  %v1170_v62 = vadd.f32 %v1145_v58, %v5214_v51  ;;  %v3788_v1 = vpop.f32.mrb[31].mxu0 }
 0x222   : > { %3854 = vmatmul.mubr.bf16.gmra.mrb[44].mxu0 %v1306_v40  ;;  %v1351_v3 = vshll.u32 %v1306_v40, 16  ;;  %v1650_v5 = vrot.slane %v1306_v40, 1 }
 0x223   : > { %v1289_v6 = vmul.f32 0.1, %v1186_v61  ;;  %v1187_v9 = vadd.f32 %v5228_v17, %v1170_v62  ;;  %3857 = vmatprep.mubr.msk.bf16.mxu0 %vm4629_vm0, %v4628_v0  ;;  %vm1279_vm5 = vcmp.ge.f32.partialorder %v1186_v61, 0.0 }
 0x224   : > { %v1353_v10 = vrot.slane %v1351_v3, 1  ;;  %v5243_v13 = vsel %vm1029_vm13, %v1649_v4, %v1650_v5  ;;  %v4266_v4 = vld [vmem:[#allocation10 + $0xa0] sm:$0xff]  }
 0x225   : > { %vm1280_vm7 = vcmp.ge.f32.partialorder %v1187_v9, 0.0  ;;  %v1290_v51 = vmul.f32 0.1, %v1187_v9  ;;  %v1299_v18 = vsel %vm1279_vm5, %v1186_v61, %v1289_v6 }
 0x226   : > { %v1150_v15 = vpop.f32.mrb[32].mxu0  ;;  %v1354_v16 = vsel %vm720_vm6, %v1349_v45, %v1353_v10  ;;  %v4267_v45 = vld [vmem:[#allocation10 + $0xa8] sm:$0xff]  }
 0x227   : > { %v1300_v19 = vsel %vm1280_vm7, %v1187_v9, %v1290_v51  ;;  %v1171_v22 = vadd.f32 %v1150_v15, %v5216_v57  ;;  %v3791_v23 = vpop.f32.mrb[33].mxu0  ;;  %3814 = vmatmul.mubr.bf16.vlgmr.msra.gmra.mrb[20].mxu1 %v1354_v16  ;;  %v1355_v57 = vshrl.u32 %v1306_v40, 16  ;;  %vm2023_vm7 = vsmask.f32 6400 }
 0x228   : > { %v1153_v25 = vpop.f32.mrb[34].mxu0  ;;  %3870 = vmatpush3.bf16.msra.mxu1 %v4262_v12  ;;  %v1307_v27 = vpack.c.bf16 %v1300_v19, %v1299_v18  ;;  %3817 = vmatprep.mubr.msk.bf16.mxu1 %vm4629_vm0, %v4628_v0  ;;  %v4268_v19 = vld [vmem:[#allocation10 + $0xb0] sm:$0xff]   ;;  %v4269_v23 = vld [vmem:[#allocation10 + $0xb8] sm:$0xff]  }
 0x229   : > { %v1188_v29 = vadd.f32 %v5228_v17, %v1171_v22  ;;  %v1172_v30 = vadd.f32 %v1153_v25, %v5218_v63  ;;  %v3792_v35 = vpop.f32.mrb[35].mxu0  ;;  %3871 = vmatprep.subr.bf16.mxu1 %v4628_v0  ;;  %v1357_v42 = vor.u32 %v1355_v57, %v1353_v10  ;;  %v4264_v63 = vld [vmem:[#allocation10 + $0x90] sm:$0xff]   ;;  %v4276_v57 = vld [vmem:[#allocation11 + $0x20] sm:$0xff]  }
 0x22a   : > { %3858 = vmatmul.mubr.bf16.gmra.mrb[48].mxu0 %v1307_v27  ;;  %v1359_v37 = vshll.u32 %v1307_v27, 16  ;;  %v1652_v38 = vrot.slane %v1307_v27, 1  ;;  %v1363_v59 = vshrl.u32 %v1307_v27, 16  ;;  %v4272_v35 = vld [vmem:[#allocation11 + $0x40] sm:$0xff]  }
 0x22b   : > { %v1291_v39 = vmul.f32 0.1, %v1188_v29  ;;  %v1189_v41 = vadd.f32 %v5228_v17, %v1172_v30  ;;  %3861 = vmatprep.mubr.msk.bf16.mxu0 %vm4629_vm0, %v4628_v0  ;;  %vm1281_vm8 = vcmp.ge.f32.partialorder %v1188_v29, 0.0  ;;  %v4275_v30 = vld [vmem:[#allocation11 + $0x18] sm:$0xff]   ;;  %3906 = vmatpush3.bf16.msra.mxu0 %v4272_v35 }
 0x22c   : > { %3872 = vmatpush3.bf16.msra.mxu1 %v4263_v28  ;;  %v1361_v43 = vrot.slane %v1359_v37, 1  ;;  %v5260_v44 = vsel %vm1029_vm13, %v1650_v5, %v1652_v38  ;;  %v4271_v28 = vld [vmem:[#allocation11 + $0x8] sm:$0xff]   ;;  %3907 = vmatprep.subr.bf16.mxu0 %v4628_v0 }
 0x22d   : > { %vm1282_vm9 = vcmp.ge.f32.partialorder %v1189_v41, 0.0  ;;  %v1292_v46 = vmul.f32 0.1, %v1189_v41  ;;  %3873 = vmatprep.subr.bf16.mxu1 %v4628_v0  ;;  %v1301_v49 = vsel %vm1281_vm8, %v1188_v29, %v1291_v39  ;;  %v4273_v29 = vld [vmem:[#allocation11 + $0x10] sm:$0xff]   ;;  %v4274_v37 = vld [vmem:[#allocation11 + $0x48] sm:$0xff]  }
 0x22e   : > { %v1158_v26 = vpop.f32.mrb[36].mxu0  ;;  %v1362_v47 = vsel %vm720_vm6, %v1357_v42, %v1361_v43  ;;  %v1365_v1 = vor.u32 %v1363_v59, %v1361_v43  ;;  %v4277_v39 = vld [vmem:[#allocation11 + $0x50] sm:$0xff]   ;;  %v4282_v42 = vld [vmem:[#allocation11 + $0x38] sm:$0xff]   ;;  %v4281_v43 = vld [vmem:[#allocation11 + $0x60] sm:$0xff]  }
 0x22f   : > { %v1302_v50 = vsel %vm1282_vm9, %v1189_v41, %v1292_v46  ;;  %v1173_v52 = vadd.f32 %v1158_v26, %v5220_v8  ;;  %v3795_v34 = vpop.f32.mrb[37].mxu0  ;;  %3818 = vmatmul.mubr.bf16.gmra.mrb[24].mxu1 %v1362_v47  ;;  %3908 = vmatpush3.bf16.msra.mxu0 %v4274_v37  ;;  %v4280_v41 = vld [vmem:[#allocation11 + $0x30] sm:$0xff]   ;;  %v4285_v46 = vld [vmem:[#allocation11 + $0x78] sm:$0xff]  }
 0x230   : > { %v1161_v54 = vpop.f32.mrb[38].mxu0  ;;  %v1308_v55 = vpack.c.bf16 %v1302_v50, %v1301_v49  ;;  %3874 = vmatpush3.bf16.msra.mxu1 %v4264_v63  ;;  %3821 = vmatprep.mubr.msk.bf16.mxu1 %vm4629_vm0, %v4628_v0  ;;  %v4283_v63 = vld [vmem:[#allocation11 + $0x68] sm:$0xff]  }
 0x231   : > { %v1190_v58 = vadd.f32 %v5228_v17, %v1173_v52  ;;  %v3796_v40 = vpop.f32.mrb[39].mxu0  ;;  %3875 = vmatprep.subr.bf16.mxu1 %v4628_v0  ;;  %3909 = vmatprep.subr.bf16.mxu0 %v4628_v0 }
 0x232   : > { %3862 = vmatmul.mubr.bf16.gmra.mrb[52].mxu0 %v1308_v55  ;;  %v1367_v61 = vshll.u32 %v1308_v55, 16  ;;  %v1654_v62 = vrot.slane %v1308_v55, 1  ;;  %v1371_v10 = vshrl.u32 %v1308_v55, 16 }
 0x233   : > { %v1273_v8 = vsel %vm1233_vm10, %v1190_v58, 0.0  ;;  %3865 = vmatprep.mubr.msk.bf16.mxu0 %vm4629_vm0, %v4628_v0  ;;  %3910 = vmatpush3.bf16.msra.mxu0 %v4277_v39 }
 0x234   : > { %vm1283_vm11 = vcmp.ge.f32.partialorder %v1273_v8, 0.0  ;;  %v1293_v2 = vmul.f32 0.1, %v1273_v8  ;;  %v1369_v3 = vrot.slane %v1367_v61, 1  ;;  %3876 = vmatpush3.bf16.msra.mxu1 %v4265_v56  ;;  %v1655_v5 = vsel %vm1029_vm13, %v1652_v38, %v1654_v62  ;;  %v4278_v38 = vld [vmem:[#allocation11 + $0x28] sm:$0xff]   ;;  %3911 = vmatprep.subr.bf16.mxu0 %v4628_v0 }
 0x235   : > { %3877 = vmatprep.subr.bf16.mxu1 %v4628_v0 }
 0x236   : > { %v1303_v17 = vsel %vm1283_vm11, %v1273_v8, %v1293_v2  ;;  %v1370_v6 = vsel %vm720_vm6, %v1365_v1, %v1369_v3  ;;  %v1373_v15 = vor.u32 %v1371_v10, %v1369_v3 }
 0x237   : > { %3822 = vmatmul.mubr.bf16.gmra.mrb[28].mxu1 %v1370_v6  ;;  %v1309_v9 = vpack.c.bf16 %v4628_v0, %v1303_v17  ;;  %3912 = vmatpush3.bf16.msra.mxu0 %v4279_v21 }
 0x238   : > { %3878 = vmatpush3.bf16.msra.mxu1 %v4266_v4  ;;  %3825 = vmatprep.mubr.msk.bf16.mxu1 %vm4629_vm0, %v4628_v0 }
 0x239   : > { %v1375_v12 = vshll.u32 %v1309_v9, 16  ;;  %3879 = vmatprep.subr.bf16.mxu1 %v4628_v0  ;;  %v1656_v51 = vrot.slane %v1309_v9, 1  ;;  %v1379_v25 = vshrl.u32 %v1309_v9, 16  ;;  %3913 = vmatprep.subr.bf16.mxu0 %v4628_v0 }
 0x23a   : > { %3866 = vmatmul.mubr.bf16.gmra.mrb[56].mxu0 %v1309_v9 }
 0x23b   : > { %v1377_v16 = vrot.slane %v1375_v12, 1  ;;  %v1657_v18 = vsel %vm1029_vm13, %v1654_v62, %v1656_v51  ;;  %3921 = vmatprep.mubr.msk.bf16.mxu0 %vm4629_vm0, %v4628_v0  ;;  %3914 = vmatpush3.bf16.msra.mxu0 %v4281_v43 }
 0x23c   : > { %3880 = vmatpush3.bf16.msra.mxu1 %v4267_v45  ;;  %3915 = vmatprep.subr.bf16.mxu0 %v4628_v0 }
 0x23d   : > { %v1378_v22 = vsel %vm720_vm6, %v1373_v15, %v1377_v16  ;;  %3881 = vmatprep.subr.bf16.mxu1 %v4628_v0  ;;  %v1381_v27 = vor.u32 %v1379_v25, %v1377_v16 }
 0x23f   : > { %3826 = vmatmul.mubr.bf16.gmra.mrb[32].mxu1 %v1378_v22  ;;  %3916 = vmatpush3.bf16.msra.mxu0 %v4283_v63 }
 0x240   : > { %3829 = vmatprep.mubr.msk.bf16.mxu1 %vm4629_vm0, %v4628_v0  ;;  %3882 = vmatpush3.bf16.msra.mxu1 %v4268_v19 }
 0x241   : > { %3883 = vmatprep.subr.bf16.mxu1 %v4628_v0  ;;  %3917 = vmatprep.subr.bf16.mxu0 %v4628_v0 }
 0x244   : > { %3884 = vmatpush3.bf16.msra.mxu1 %v4269_v23 }
 0x245   : > { %3941 = vmatprep.subr.bf16.mxu1 %v4628_v0 }
 0x247   : > { %3830 = vmatmul.mubr.bf16.gmra.mrb[36].mxu1 %v1381_v27 }
 0x248   : > { %3885 = vmatprep.mubr.msk.bf16.mxu1 %vm4629_vm0, %v4628_v0 }
 0x24f   : > { %3886 = vmatmul.mubr.bf16.vlgmr.msra.gmra.mrb[40].mxu1 %v5243_v13  ;;  %v4270_v13 = vld [vmem:[#allocation11] sm:$0xff]  }
 0x250   : > { %3889 = vmatprep.mubr.msk.bf16.mxu1 %vm4629_vm0, %v4628_v0  ;;  %3942 = vmatpush3.bf16.msra.mxu1 %v4270_v13 }
 0x251   : > { %3943 = vmatprep.subr.bf16.mxu1 %v4628_v0 }
 0x254   : > { %3944 = vmatpush3.bf16.msra.mxu1 %v4271_v28 }
 0x255   : > { %3945 = vmatprep.subr.bf16.mxu1 %v4628_v0 }
 0x257   : > { %3890 = vmatmul.mubr.bf16.gmra.mrb[44].mxu1 %v5260_v44  ;;  %v4284_v44 = vld [vmem:[#allocation11 + $0x70] sm:$0xff]  }
 0x258   : > { %3893 = vmatprep.mubr.msk.bf16.mxu1 %vm4629_vm0, %v4628_v0  ;;  %3946 = vmatpush3.bf16.msra.mxu1 %v4273_v29 }
 0x259   : > { %3947 = vmatprep.subr.bf16.mxu1 %v4628_v0  ;;  %3918 = vmatpush3.bf16.msra.mxu0 %v4284_v44 }
 0x25a   : > { %3919 = vmatprep.subr.bf16.mxu0 %v4628_v0 }
 0x25c   : > { %3948 = vmatpush3.bf16.msra.mxu1 %v4275_v30 }
 0x25d   : > { %3949 = vmatprep.subr.bf16.mxu1 %v4628_v0  ;;  %3920 = vmatpush3.bf16.msra.mxu0 %v4285_v46  ;;  %v5325_v46 = vld [vmem:[%s5698_s8] ss:$0 sm:$0xff] }
 0x25e   : > { %3977 = vmatprep.subr.bf16.mxu0 %v4628_v0 }
 0x25f   : > { %3894 = vmatmul.mubr.bf16.gmra.mrb[48].mxu1 %v1655_v5 }
 0x260   : > { %3897 = vmatprep.mubr.msk.bf16.mxu1 %vm4629_vm0, %v4628_v0  ;;  %3950 = vmatpush3.bf16.msra.mxu1 %v4276_v57 }
 0x261   : > { %3951 = vmatprep.subr.bf16.mxu1 %v4628_v0 }
 0x264   : > { %3952 = vmatpush3.bf16.msra.mxu1 %v4278_v38 }
 0x265   : > { %3953 = vmatprep.subr.bf16.mxu1 %v4628_v0 }
 0x267   : > { %3898 = vmatmul.mubr.bf16.gmra.mrb[52].mxu1 %v1657_v18 }
 0x268   : > { %3901 = vmatprep.mubr.msk.bf16.mxu1 %vm4629_vm0, %v4628_v0  ;;  %3954 = vmatpush3.bf16.msra.mxu1 %v4280_v41 }
 0x269   : > { %3955 = vmatprep.subr.bf16.mxu1 %v4628_v0 }
 0x26c   : > { %3956 = vmatpush3.bf16.msra.mxu1 %v4282_v42 }
 0x26f   : > { %3902 = vmatmul.mubr.bf16.gmra.mrb[56].mxu1 %v1656_v51 }
 0x270   : > { %3957 = vmatprep.mubr.msk.bf16.mxu1 %vm4629_vm0, %v4628_v0 }
 0x2ed   : > { %v1589_v26 = vpop.f32.mrb[40].mxu0 }
 0x2ee   : > { %v3851_v47 = vpop.f32.mrb[41].mxu0 }
 0x2ef   : > { %v1592_v49 = vpop.f32.mrb[42].mxu0 }
 0x2f0   : > { %v3852_v50 = vpop.f32.mrb[43].mxu0 }
 0x2f5   : > { %v1597_v52 = vpop.f32.mrb[44].mxu0 }
 0x2f6   : > { %v3855_v34 = vpop.f32.mrb[45].mxu0 }
 0x2f7   : > { %v1600_v54 = vpop.f32.mrb[46].mxu0 }
 0x2f8   : > { %v3856_v55 = vpop.f32.mrb[47].mxu0 }
 0x2fa   : > { %v1469_v56 = vpop.f32.mrb[20].mxu1 }
 0x2fb   : > { %v1590_v58 = vadd.f32 %v1589_v26, %v1469_v56  ;;  %v3815_v40 = vpop.f32.mrb[21].mxu1 }
 0x2fc   : > { %v1472_v59 = vpop.f32.mrb[22].mxu1 }
 0x2fd   : > { %v1593_v61 = vadd.f32 %v1592_v49, %v1472_v59  ;;  %v3816_v62 = vpop.f32.mrb[23].mxu1  ;;  %v1605_v8 = vpop.f32.mrb[48].mxu0 }
 0x2fe   : > { %v3859_v1 = vpop.f32.mrb[49].mxu0 }
 0x2ff   : > { %v1608_v2 = vpop.f32.mrb[50].mxu0 }
 0x300   : > { %v3860_v3 = vpop.f32.mrb[51].mxu0 }
 0x302   : > { %v1477_v4 = vpop.f32.mrb[24].mxu1 }
 0x303   : > { %v1598_v5 = vadd.f32 %v1597_v52, %v1477_v4  ;;  %v3819_v17 = vpop.f32.mrb[25].mxu1 }
 0x304   : > { %v1480_v6 = vpop.f32.mrb[26].mxu1 }
 0x305   : > { %v1601_v9 = vadd.f32 %v1600_v54, %v1480_v6  ;;  %v3820_v45 = vpop.f32.mrb[27].mxu1  ;;  %v1613_v10 = vpop.f32.mrb[52].mxu0 }
 0x306   : > { %v3863_v12 = vpop.f32.mrb[53].mxu0 }
 0x307   : > { %v1616_v51 = vpop.f32.mrb[54].mxu0 }
 0x308   : > { %v3864_v15 = vpop.f32.mrb[55].mxu0 }
 0x30a   : > { %v1485_v16 = vpop.f32.mrb[28].mxu1 }
 0x30b   : > { %v1606_v18 = vadd.f32 %v1605_v8, %v1485_v16  ;;  %v3823_v19 = vpop.f32.mrb[29].mxu1  ;;  %v1857_v8 = vadd.s32 4294967292, %v5222_v11 }
 0x30c   : > { %v1488_v22 = vpop.f32.mrb[30].mxu1 }
 0x30d   : > { %v1609_v23 = vadd.f32 %v1608_v2, %v1488_v22  ;;  %v3824_v25 = vpop.f32.mrb[31].mxu1  ;;  %v1621_v27 = vpop.f32.mrb[56].mxu0  ;;  %vm1866_vm14 = vcmp.ge.s32.totalorder %v1857_v8, 0 }
 0x30e   : > { %v3867_v13 = vpop.f32.mrb[57].mxu0 }
 0x30f   : > { %v1624_v28 = vpop.f32.mrb[58].mxu0 }
 0x310   : > { %v3868_v29 = vpop.f32.mrb[59].mxu0 }
 0x312   : > { %v1493_v30 = vpop.f32.mrb[32].mxu1 }
 0x313   : > { %v5316_v35 = vadd.f32 %v1613_v10, %v1493_v30  ;;  %v3827_v57 = vpop.f32.mrb[33].mxu1 }
 0x314   : > { %v1496_v37 = vpop.f32.mrb[34].mxu1 }
 0x315   : > { %v5318_v38 = vadd.f32 %v1616_v51, %v1496_v37  ;;  %v3828_v39 = vpop.f32.mrb[35].mxu1 }
 0x31a   : > { %v1501_v41 = vpop.f32.mrb[36].mxu1 }
 0x31b   : > { %v5320_v21 = vadd.f32 %v1621_v27, %v1501_v41  ;;  %v3831_v42 = vpop.f32.mrb[37].mxu1 }
 0x31c   : > { %v1504_v43 = vpop.f32.mrb[38].mxu1 }
 0x31d   : > { %v3832_v63 = vpop.f32.mrb[39].mxu1 }
 0x322   : > { %v1745_v44 = vpop.f32.mrb[40].mxu1 }
 0x323   : > { %v1783_v26 = vadd.f32 %v1745_v44, %v1590_v58  ;;  %v3887_v47 = vpop.f32.mrb[41].mxu1 }
 0x324   : > { %v1748_v49 = vpop.f32.mrb[42].mxu1 }
 0x325   : > { %v1799_v50 = vadd.f32 %v5325_v46, %v1783_v26  ;;  %v1784_v52 = vadd.f32 %v1748_v49, %v1593_v61  ;;  %v3888_v34 = vpop.f32.mrb[43].mxu1 }
 0x327   : > { %v1818_v54 = vrot.slane %v1799_v50, 6  ;;  %v1800_v55 = vadd.f32 %v5325_v46, %v1784_v52 }
 0x329   : > { %v1819_v56 = vrot.slane %v1800_v55, 6  ;;  %v1845_v40 = vadd.f32 %v1818_v54, %v5057_v36 }
 0x32a   : > { %v1753_v59 = vpop.f32.mrb[44].mxu1 }
 0x32b   : > { %v1820_v62 = vsel %vm1817_vm12, %v1818_v54, %v1819_v56  ;;  %v1785_v1 = vadd.f32 %v1753_v59, %v1598_v5  ;;  %v3891_v58 = vpop.f32.mrb[45].mxu1  ;;  %v1921_v6 = vrot.slane %v1845_v40, 2 }
 0x32c   : > { %v1846_v2 = vadd.f32 %v1820_v62, %v5048_v31  ;;  %v1756_v3 = vpop.f32.mrb[46].mxu1 }
 0x32d   : > { %v1801_v61 = vadd.f32 %v5325_v46, %v1785_v1  ;;  %v1786_v4 = vadd.f32 %v1756_v3, %v1601_v9  ;;  %v3892_v17 = vpop.f32.mrb[47].mxu1 }
 0x32e   : > { %v1922_v45 = vrot.slane %v1846_v2, 2 }
 0x32f   : > { %v1821_v10 = vrot.slane %v1801_v61, 6  ;;  %v1802_v36 = vadd.f32 %v5325_v46, %v1786_v4 }
 0x330   : > { %v1923_v12 = vsel %vm622_vm1, %v1921_v6, %v1922_v45 }
 0x331   : > { %v1822_v51 = vsel %vm1817_vm12, %v1819_v56, %v1821_v10  ;;  %v1823_v15 = vrot.slane %v1802_v36, 6  ;;  %v5337_v5 = vsel %vm1866_vm14, %v1923_v12, 0.0 }
 0x332   : > { %v1847_v31 = vadd.f32 %v1822_v51, %v5051_v32  ;;  %v1761_v16 = vpop.f32.mrb[48].mxu1  ;;  %v1967_v57 = vmul.f32 0.1, %v5337_v5  ;;  %vm1958_vm15 = vcmp.ge.f32.partialorder %v5337_v5, 0.0 }
 0x333   : > { %v1824_v19 = vsel %vm1817_vm12, %v1821_v10, %v1823_v15  ;;  %v1787_v9 = vadd.f32 %v1761_v16, %v1606_v18  ;;  %v3895_v22 = vpop.f32.mrb[49].mxu1 }
 0x334   : > { %v1924_v25 = vrot.slane %v1847_v31, 2  ;;  %v1848_v27 = vadd.f32 %v1824_v19, %v5054_v33  ;;  %v1764_v13 = vpop.f32.mrb[50].mxu1  ;;  %v1976_v43 = vsel %vm1958_vm15, %v5337_v5, %v1967_v57  ;;  %v1865_v57 = vadd.s32 4294967292, %v5248_v24 }
 0x335   : > { %v1803_v28 = vadd.f32 %v5325_v46, %v1787_v9  ;;  %v1788_v29 = vadd.f32 %v1764_v13, %v1609_v23  ;;  %v3896_v30 = vpop.f32.mrb[51].mxu1 }
 0x336   : > { %v5345_v37 = vsel %vm622_vm1, %v1922_v45, %v1924_v25  ;;  %v1926_v39 = vrot.slane %v1848_v27, 2  ;;  %vm1883_vm9 = vcmp.lt.s32.totalorder %v1865_v57, 64 }
 0x337   : > { %v1825_v32 = vrot.slane %v1803_v28, 6  ;;  %v1804_v18 = vadd.f32 %v5325_v46, %v1788_v29  ;;  %vm1959_vm2 = vcmp.ge.f32.partialorder %v5345_v37, 0.0  ;;  %v1968_v33 = vmul.f32 0.1, %v5345_v37 }
 0x338   : > { %v5352_v41 = vsel %vm622_vm1, %v1924_v25, %v1926_v39 }
 0x339   : > { %v1826_v23 = vsel %vm1817_vm12, %v1823_v15, %v1825_v32  ;;  %v1827_v42 = vrot.slane %v1804_v18, 6  ;;  %v1977_v63 = vsel %vm1959_vm2, %v5345_v37, %v1968_v33  ;;  %vm1960_vm3 = vcmp.ge.f32.partialorder %v5352_v41, 0.0  ;;  %v4286_v18 = vld [vmem:[#allocation11 + $0x80] sm:$0xff]  }
 0x33a   : > { %v1849_v44 = vadd.f32 %v1826_v23, %v5074_v48  ;;  %v1769_v26 = vpop.f32.mrb[52].mxu1  ;;  %v5358_v47 = vpack.c.bf16 %v1977_v63, %v1976_v43  ;;  %v1969_v48 = vmul.f32 0.1, %v5352_v41 }
 0x33b   : > { %v1828_v49 = vsel %vm1817_vm12, %v1825_v32, %v1827_v42  ;;  %v1789_v50 = vadd.f32 %v1769_v26, %v5316_v35  ;;  %v3899_v52 = vpop.f32.mrb[53].mxu1 }
 0x33c   : > { %v1928_v34 = vrot.slane %v1849_v44, 2  ;;  %v1850_v54 = vadd.f32 %v1828_v49, %v5085_v53  ;;  %v1772_v55 = vpop.f32.mrb[54].mxu1  ;;  %3958 = vmatmul.mubr.bf16.vlgmr.msra.gmra.mrb[60].mxu1 %v5358_v47  ;;  %v2025_v53 = vshrl.u32 %v5358_v47, 16  ;;  %v2028_v8 = vshll.u32 %v5358_v47, 16 }
 0x33d   : > { %v1805_v56 = vadd.f32 %v5325_v46, %v1789_v50  ;;  %v1790_v40 = vadd.f32 %v1772_v55, %v5318_v38  ;;  %v3900_v59 = vpop.f32.mrb[55].mxu1  ;;  %3961 = vmatprep.mubr.msk.bf16.mxu1 %vm4629_vm0, %v4628_v0  ;;  %v1978_v4 = vsel %vm1960_vm3, %v5352_v41, %v1969_v48 }
 0x33e   : > { %v1930_v35 = vrot.slane %v1850_v54, 2  ;;  %v5371_v62 = vsel %vm622_vm1, %v1926_v39, %v1928_v34  ;;  %v2027_v15 = vrot.slane %v2025_v53, 1  ;;  %v2030_v31 = vrot.slane %v2028_v8, 2  ;;  %v4288_v8 = vld [vmem:[#allocation11 + $0x90] sm:$0xff]  }
 0x33f   : > { %v1829_v1 = vrot.slane %v1805_v56, 6  ;;  %v1806_v58 = vadd.f32 %v5325_v46, %v1790_v40  ;;  %vm1961_vm4 = vcmp.ge.f32.partialorder %v5371_v62, 0.0  ;;  %v1970_v38 = vmul.f32 0.1, %v5371_v62 }
 0x340   : > { %v5379_v2 = vsel %vm622_vm1, %v1928_v34, %v1930_v35  ;;  %v2031_v39 = vor.u32 %v2030_v31, %v2027_v15 }
 0x341   : > { %v1830_v3 = vsel %vm1817_vm12, %v1827_v42, %v1829_v1  ;;  %v1831_v61 = vrot.slane %v1806_v58, 6  ;;  %v1979_v17 = vsel %vm1961_vm4, %v5371_v62, %v1970_v38  ;;  %vm1962_vm5 = vcmp.ge.f32.partialorder %v5379_v2, 0.0 }
 0x342   : > { %v1851_v6 = vadd.f32 %v1830_v3, %v5099_v60  ;;  %v1777_v45 = vpop.f32.mrb[56].mxu1  ;;  %v5385_v10 = vpack.c.bf16 %v1979_v17, %v1978_v4 }
 0x343   : > { %v1832_v36 = vsel %vm1817_vm12, %v1829_v1, %v1831_v61  ;;  %v1791_v12 = vadd.f32 %v1777_v45, %v5320_v21  ;;  %v3903_v51 = vpop.f32.mrb[57].mxu1  ;;  %v1971_v21 = vmul.f32 0.1, %v5379_v2 }
 0x344   : > { %v1932_v16 = vrot.slane %v1851_v6, 2  ;;  %v1852_v19 = vadd.f32 %v1832_v36, %v5111_v7  ;;  %v1780_v9 = vpop.f32.mrb[58].mxu1  ;;  %3962 = vmatmul.mubr.bf16.gmra.mrb[64].mxu1 %v5385_v10  ;;  %v2033_v22 = vshrl.u32 %v5385_v10, 16  ;;  %v2036_v60 = vshll.u32 %v5385_v10, 16  ;;  %v4289_v36 = vld [vmem:[#allocation11 + $0x98] sm:$0xff]  }
 0x345   : > { %v1807_v25 = vadd.f32 %v5325_v46, %v1791_v12  ;;  %v3904_v27 = vpop.f32.mrb[59].mxu1  ;;  %3965 = vmatprep.mubr.msk.bf16.mxu1 %vm4629_vm0, %v4628_v0  ;;  %v1980_v43 = vsel %vm1962_vm5, %v5379_v2, %v1971_v21  ;;  %v4292_v21 = vld [vmem:[#allocation11 + $0xb0] sm:$0xff]  }
 0x346   : > { %v1934_v13 = vrot.slane %v1852_v19, 2  ;;  %v2035_v28 = vrot.slane %v2033_v22, 1  ;;  %v2038_v7 = vrot.slane %v2036_v60, 2  ;;  %v5399_v29 = vsel %vm622_vm1, %v1930_v35, %v1932_v16  ;;  %v4290_v19 = vld [vmem:[#allocation11 + $0xa0] sm:$0xff]  }
 0x347   : > { %v1833_v30 = vrot.slane %v1807_v25, 6  ;;  %vm1963_vm8 = vcmp.ge.f32.partialorder %v5399_v29, 0.0  ;;  %v1972_v46 = vmul.f32 0.1, %v5399_v29  ;;  %v4291_v25 = vld [vmem:[#allocation11 + $0xa8] sm:$0xff]  }
 0x348   : > { %v2039_v32 = vor.u32 %v2038_v7, %v2035_v28  ;;  %v5405_v33 = vsel %vm622_vm1, %v1932_v16, %v1934_v13  ;;  %v4293_v28 = vld [vmem:[#allocation11 + $0xb8] sm:$0xff]   ;;  %v2337_v7 = vrot.slane %v5385_v10, 3 }
 0x349   : > { %v1834_v23 = vsel %vm1817_vm12, %v1831_v61, %v1833_v30  ;;  %v1854_v42 = vadd.f32 %v1833_v30, %v5118_v14  ;;  %v1981_v63 = vsel %vm1963_vm8, %v5399_v29, %v1972_v46  ;;  %v4287_v14 = vld [vmem:[#allocation11 + $0x88] sm:$0xff]   ;;  %vm1964_vm10 = vcmp.ge.f32.partialorder %v5405_v33, 0.0 }
 0x34a   : > { %v1853_v44 = vadd.f32 %v1834_v23, %v5129_v20  ;;  %v2040_v26 = vsel %vm2023_vm7, %v2031_v39, %v2039_v32  ;;  %v5415_v49 = vpack.c.bf16 %v1981_v63, %v1980_v43  ;;  %v1973_v20 = vmul.f32 0.1, %v5405_v33  ;;  %v4294_v23 = vld [vmem:[#allocation13] sm:$0xff]   ;;  %v4296_v43 = vld [vmem:[#allocation13 + $0x10] sm:$0xff]   ;;  %v4297_v63 = vld [vmem:[#allocation13 + $0x18] sm:$0xff]  }
 0x34b   : > { %v1938_v50 = vrot.slane %v1854_v42, 2  ;;  %3922 = vmatmul.mubr.bf16.vlgmr.msra.gmra.mrb[60].mxu0 %v2040_v26  ;;  %v2336_v30 = vrot.slane %v5358_v47, 3  ;;  %4037 = vmatprep.subr.bf16.mxu1 %v4294_v23  ;;  %v4295_v42 = vld [vmem:[#allocation13 + $0x8] sm:$0xff]   ;;  %v4298_v26 = vld [vmem:[#allocation13 + $0x20] sm:$0xff]  }
 0x34c   : > { %v1936_v52 = vrot.slane %v1853_v44, 2  ;;  %3966 = vmatmul.mubr.bf16.gmra.mrb[68].mxu1 %v5415_v49  ;;  %3978 = vmatpush3.bf16.msra.mxu0 %v4286_v18  ;;  %v2042_v34 = vshrl.u32 %v5415_v49, 16  ;;  %v2045_v54 = vshll.u32 %v5415_v49, 16  ;;  %v1982_v58 = vsel %vm1964_vm10, %v5405_v33, %v1973_v20  ;;  %v4299_v44 = vld [vmem:[#allocation13 + $0x40] sm:$0xff]  }
 0x34d   : > { %3979 = vmatprep.subr.bf16.mxu0 %v4628_v0  ;;  %3925 = vmatprep.mubr.msk.bf16.mxu0 %vm4629_vm0, %v4628_v0  ;;  %v2339_v57 = vrot.slane %v5415_v49, 3  ;;  %v4300_v49 = vld [vmem:[#allocation13 + $0x48] sm:$0xff]   ;;  %v5471_v20 = vld [vmem:[#allocation13 + $0x80] sm:$0xff]  }
 0x34e   : > { %v1939_v55 = vsel %vm622_vm1, %v1936_v52, %v1938_v50  ;;  %v2044_v56 = vrot.slane %v2042_v34, 1  ;;  %v2047_v40 = vrot.slane %v2045_v54, 2  ;;  %3969 = vmatprep.mubr.msk.bf16.mxu1 %vm4629_vm0, %v4628_v0  ;;  %v5429_v59 = vsel %vm622_vm1, %v1934_v13, %v1936_v52  ;;  %4038 = vmatpush3.bf16.msra.mxu1 %v4294_v23  ;;  %v4302_v50 = vld [vmem:[#allocation13 + $0x50] sm:$0xff]   ;;  %v4305_v34 = vld [vmem:[#allocation13 + $0x38] sm:$0xff]   ;;  %v4306_v54 = vld [vmem:[#allocation13 + $0x60] sm:$0xff]  }
 0x34f   : > { %v5432_v48 = vsel %vm1883_vm9, %v1939_v55, 0.0  ;;  %vm1965_vm11 = vcmp.ge.f32.partialorder %v5429_v59, 0.0  ;;  %v1974_v35 = vmul.f32 0.1, %v5429_v59  ;;  %vm2335_vm1 = vcmask 1044480   ;;  %4039 = vmatprep.subr.bf16.mxu1 %v4295_v42  ;;  %v4303_v52 = vld [vmem:[#allocation13 + $0x30] sm:$0xff]  }
 0x350   : > { %3980 = vmatpush3.bf16.msra.mxu0 %v4287_v14  ;;  %v2048_v53 = vor.u32 %v2047_v40, %v2044_v56  ;;  %vm1966_vm14 = vcmp.ge.f32.partialorder %v5432_v48, 0.0  ;;  %v1975_v1 = vmul.f32 0.1, %v5432_v48  ;;  %v2338_v46 = vsel %vm2335_vm1, %v2336_v30, %v2337_v7  ;;  %v4304_v14 = vld [vmem:[#allocation13 + $0x58] sm:$0xff]   ;;  %v4308_v55 = vld [vmem:[#allocation13 + $0x68] sm:$0xff]   ;;  %v4310_v56 = vld [vmem:[#allocation13 + $0x70] sm:$0xff]  }
 0x351   : > { %v1983_v38 = vsel %vm1965_vm11, %v5429_v59, %v1974_v35  ;;  %3981 = vmatprep.subr.bf16.mxu0 %v4628_v0  ;;  %v2340_v39 = vsel %vm2335_vm1, %v2337_v7, %v2339_v57  ;;  %v4312_v40 = vld [vmem:[#allocation13 + $0x78] sm:$0xff]  }
 0x352   : > { %v2049_v3 = vsel %vm2023_vm7, %v2039_v32, %v2048_v53  ;;  %v1988_v61 = vpack.c.bf16 %v1983_v38, %v1982_v58  ;;  %v1984_v4 = vsel %vm1966_vm14, %v5432_v48, %v1975_v1  ;;  %4040 = vmatpush3.bf16.msra.mxu1 %v4295_v42 }
 0x353   : > { %3926 = vmatmul.mubr.bf16.gmra.mrb[64].mxu0 %v2049_v3  ;;  %v1989_v17 = vpack.c.bf16 %v1984_v4, %v1984_v4  ;;  %4041 = vmatprep.subr.bf16.mxu1 %v4296_v43 }
 0x354   : > { %3970 = vmatmul.mubr.bf16.gmra.mrb[72].mxu1 %v1988_v61  ;;  %3982 = vmatpush3.bf16.msra.mxu0 %v4288_v8  ;;  %v2051_v6 = vshrl.u32 %v1988_v61, 16  ;;  %v2054_v45 = vshll.u32 %v1988_v61, 16  ;;  %v2341_v32 = vrot.slane %v1988_v61, 3 }
 0x355   : > { %3929 = vmatprep.mubr.msk.bf16.mxu0 %vm4629_vm0, %v4628_v0  ;;  %3983 = vmatprep.subr.bf16.mxu0 %v4628_v0  ;;  %v2060_v15 = vshrl.u32 %v1989_v17, 16  ;;  %v2063_v31 = vshll.u32 %v1989_v17, 16  ;;  %v2343_v10 = vrot.slane %v1989_v17, 3 }
 0x356   : > { %v2053_v12 = vrot.slane %v2051_v6, 1  ;;  %v2056_v51 = vrot.slane %v2054_v45, 2  ;;  %3973 = vmatprep.mubr.msk.bf16.mxu1 %vm4629_vm0, %v4628_v0  ;;  %v2342_v18 = vsel %vm2335_vm1, %v2339_v57, %v2341_v32  ;;  %4042 = vmatpush3.bf16.msra.mxu1 %v4296_v43 }
 0x357   : > { %v2062_v22 = vrot.slane %v2060_v15, 1  ;;  %v2065_v60 = vrot.slane %v2063_v31, 2  ;;  %v2344_v47 = vsel %vm2335_vm1, %v2341_v32, %v2343_v10  ;;  %4043 = vmatprep.subr.bf16.mxu1 %v4297_v63 }
 0x358   : > { %v2057_v16 = vor.u32 %v2056_v51, %v2053_v12  ;;  %3984 = vmatpush3.bf16.msra.mxu0 %v4289_v36 }
 0x359   : > { %3985 = vmatprep.subr.bf16.mxu0 %v4628_v0  ;;  %v2066_v27 = vor.u32 %v2065_v60, %v2062_v22 }
 0x35a   : > { %v2058_v9 = vsel %vm2023_vm7, %v2048_v53, %v2057_v16  ;;  %4044 = vmatpush3.bf16.msra.mxu1 %v4297_v63 }
 0x35b   : > { %3930 = vmatmul.mubr.bf16.gmra.mrb[68].mxu0 %v2058_v9  ;;  %v2067_v13 = vsel %vm2023_vm7, %v2057_v16, %v2066_v27  ;;  %4045 = vmatprep.subr.bf16.mxu1 %v4298_v26 }
 0x35c   : > { %3974 = vmatmul.mubr.bf16.gmra.mrb[76].mxu1 %v1989_v17  ;;  %3986 = vmatpush3.bf16.msra.mxu0 %v4290_v19 }
 0x35d   : > { %3933 = vmatprep.mubr.msk.bf16.mxu0 %vm4629_vm0, %v4628_v0  ;;  %3987 = vmatprep.subr.bf16.mxu0 %v4628_v0 }
 0x35e   : > { %4046 = vmatpush3.bf16.msra.mxu1 %v4298_v26 }
 0x360   : > { %3988 = vmatpush3.bf16.msra.mxu0 %v4291_v25 }
 0x361   : > { %3989 = vmatprep.subr.bf16.mxu0 %v4628_v0 }
 0x363   : > { %3934 = vmatmul.mubr.bf16.gmra.mrb[72].mxu0 %v2067_v13 }
 0x364   : > { %3937 = vmatprep.mubr.msk.bf16.mxu0 %vm4629_vm0, %v4628_v0  ;;  %3990 = vmatpush3.bf16.msra.mxu0 %v4292_v21 }
 0x365   : > { %3991 = vmatprep.subr.bf16.mxu0 %v4628_v0 }
 0x368   : > { %3992 = vmatpush3.bf16.msra.mxu0 %v4293_v28 }
 0x369   : > { %4013 = vmatprep.subr.bf16.mxu0 %v4299_v44 }
 0x36b   : > { %3938 = vmatmul.mubr.bf16.gmra.mrb[76].mxu0 %v2066_v27 }
 0x36c   : > { %3993 = vmatprep.mubr.msk.bf16.mxu0 %vm4629_vm0, %v4628_v0 }
 0x373   : > { %3994 = vmatmul.mubr.bf16.vlgmr.msra.gmra.mrb[80].mxu0 %v2338_v46 }
 0x374   : > { %3997 = vmatprep.mubr.msk.bf16.mxu0 %vm4629_vm0, %v4628_v0  ;;  %4014 = vmatpush3.bf16.msra.mxu0 %v4299_v44 }
 0x375   : > { %4015 = vmatprep.subr.bf16.mxu0 %v4300_v49 }
 0x378   : > { %4016 = vmatpush3.bf16.msra.mxu0 %v4300_v49 }
 0x379   : > { %4017 = vmatprep.subr.bf16.mxu0 %v4302_v50 }
 0x37b   : > { %3998 = vmatmul.mubr.bf16.gmra.mrb[84].mxu0 %v2340_v39 }
 0x37c   : > { %4001 = vmatprep.mubr.msk.bf16.mxu0 %vm4629_vm0, %v4628_v0  ;;  %4018 = vmatpush3.bf16.msra.mxu0 %v4302_v50 }
 0x37d   : > { %4019 = vmatprep.subr.bf16.mxu0 %v4304_v14 }
 0x380   : > { %4020 = vmatpush3.bf16.msra.mxu0 %v4304_v14 }
 0x381   : > { %4021 = vmatprep.subr.bf16.mxu0 %v4306_v54 }
 0x383   : > { %4002 = vmatmul.mubr.bf16.gmra.mrb[88].mxu0 %v2342_v18 }
 0x384   : > { %4005 = vmatprep.mubr.msk.bf16.mxu0 %vm4629_vm0, %v4628_v0  ;;  %4022 = vmatpush3.bf16.msra.mxu0 %v4306_v54 }
 0x385   : > { %4023 = vmatprep.subr.bf16.mxu0 %v4308_v55 }
 0x388   : > { %4024 = vmatpush3.bf16.msra.mxu0 %v4308_v55  ;;  %v2497_v55 = vadd.s32 4294967295, %v5222_v11 }
 0x389   : > { %4025 = vmatprep.subr.bf16.mxu0 %v4310_v56 }
 0x38b   : > { %4006 = vmatmul.mubr.bf16.gmra.mrb[92].mxu0 %v2344_v47 }
 0x38c   : > { %4009 = vmatprep.mubr.msk.bf16.mxu0 %vm4629_vm0, %v4628_v0  ;;  %v4301_v0 = vld [vmem:[#allocation13 + $0x28] sm:$0xff]   ;;  %4026 = vmatpush3.bf16.msra.mxu0 %v4310_v56  ;;  %vm2506_vm0 = vcmp.ge.s32.totalorder %v2497_v55, 0 }
 0x38d   : > { %4047 = vmatprep.subr.bf16.mxu1 %v4301_v0  ;;  %4027 = vmatprep.subr.bf16.mxu0 %v4312_v40 }
 0x38e   : > { %4048 = vmatpush3.bf16.msra.mxu1 %v4301_v0 }
 0x38f   : > { %4049 = vmatprep.subr.bf16.mxu1 %v4303_v52 }
 0x390   : > { %4028 = vmatpush3.bf16.msra.mxu0 %v4312_v40  ;;  %v5484_v40 = vld [vmem:[%s5699_s15] ss:$0 sm:$0xff] }
 0x392   : > { %4050 = vmatpush3.bf16.msra.mxu1 %v4303_v52 }
 0x393   : > { %4010 = vmatmul.mubr.bf16.gmra.mrb[96].mxu0 %v2343_v10  ;;  %4051 = vmatprep.subr.bf16.mxu1 %v4305_v34 }
 0x396   : > { %4052 = vmatpush3.bf16.msra.mxu1 %v4305_v34 }
 0x397   : > { %4061 = vmatprep.subr.bf16.mxu1 %v5471_v20 }
 0x40f   : > { %v2275_v35 = vpop.f32.mrb[60].mxu1 }
 0x410   : > { %v3959_v53 = vpop.f32.mrb[61].mxu1 }
 0x411   : > { %v2278_v8 = vpop.f32.mrb[62].mxu1 }
 0x412   : > { %v3960_v1 = vpop.f32.mrb[63].mxu1 }
 0x417   : > { %v2283_v58 = vpop.f32.mrb[64].mxu1 }
 0x418   : > { %v3963_v38 = vpop.f32.mrb[65].mxu1 }
 0x419   : > { %v2286_v3 = vpop.f32.mrb[66].mxu1 }
 0x41a   : > { %v3964_v61 = vpop.f32.mrb[67].mxu1 }
 0x41e   : > { %v2155_v4 = vpop.f32.mrb[60].mxu0 }
 0x41f   : > { %v2276_v17 = vadd.f32 %v2275_v35, %v2155_v4  ;;  %v3923_v6 = vpop.f32.mrb[61].mxu0  ;;  %v2291_v45 = vpop.f32.mrb[68].mxu1 }
 0x420   : > { %v2158_v36 = vpop.f32.mrb[62].mxu0  ;;  %v3967_v12 = vpop.f32.mrb[69].mxu1 }
 0x421   : > { %v2279_v51 = vadd.f32 %v2278_v8, %v2158_v36  ;;  %v3924_v15 = vpop.f32.mrb[63].mxu0  ;;  %v2294_v31 = vpop.f32.mrb[70].mxu1 }
 0x422   : > { %v3968_v16 = vpop.f32.mrb[71].mxu1 }
 0x426   : > { %v2163_v19 = vpop.f32.mrb[64].mxu0 }
 0x427   : > { %v2284_v9 = vadd.f32 %v2283_v58, %v2163_v19  ;;  %v3927_v22 = vpop.f32.mrb[65].mxu0  ;;  %v2299_v60 = vpop.f32.mrb[72].mxu1 }
 0x428   : > { %v2166_v25 = vpop.f32.mrb[66].mxu0  ;;  %v3971_v27 = vpop.f32.mrb[73].mxu1 }
 0x429   : > { %v2287_v21 = vadd.f32 %v2286_v3, %v2166_v25  ;;  %v3928_v13 = vpop.f32.mrb[67].mxu0  ;;  %v2302_v28 = vpop.f32.mrb[74].mxu1 }
 0x42a   : > { %v3972_v7 = vpop.f32.mrb[75].mxu1 }
 0x42e   : > { %v2171_v30 = vpop.f32.mrb[68].mxu0 }
 0x42f   : > { %v2292_v46 = vadd.f32 %v2291_v45, %v2171_v30  ;;  %v3931_v57 = vpop.f32.mrb[69].mxu0  ;;  %v2307_v39 = vpop.f32.mrb[76].mxu1 }
 0x430   : > { %v2174_v32 = vpop.f32.mrb[70].mxu0  ;;  %v3975_v18 = vpop.f32.mrb[77].mxu1 }
 0x431   : > { %v2295_v10 = vadd.f32 %v2294_v31, %v2174_v32  ;;  %v3932_v47 = vpop.f32.mrb[71].mxu0  ;;  %v2310_v23 = vpop.f32.mrb[78].mxu1  ;;  %v4309_v32 = vld [vmem:[#allocation13 + $0x88] sm:$0xff]  }
 0x432   : > { %v3976_v42 = vpop.f32.mrb[79].mxu1 }
 0x436   : > { %v2179_v43 = vpop.f32.mrb[72].mxu0 }
 0x437   : > { %v5474_v63 = vadd.f32 %v2299_v60, %v2179_v43  ;;  %v3935_v44 = vpop.f32.mrb[73].mxu0 }
 0x438   : > { %v2182_v26 = vpop.f32.mrb[74].mxu0 }
 0x439   : > { %v5476_v49 = vadd.f32 %v2302_v28, %v2182_v26  ;;  %v3936_v0 = vpop.f32.mrb[75].mxu0 }
 0x43e   : > { %v2187_v50 = vpop.f32.mrb[76].mxu0 }
 0x43f   : > { %v5478_v52 = vadd.f32 %v2307_v39, %v2187_v50  ;;  %v3939_v14 = vpop.f32.mrb[77].mxu0 }
 0x440   : > { %v2190_v34 = vpop.f32.mrb[78].mxu0 }
 0x441   : > { %v3940_v54 = vpop.f32.mrb[79].mxu0  ;;  %v4311_v34 = vld [vmem:[#allocation13 + $0x90] sm:$0xff]  }
 0x446   : > { %v2432_v56 = vpop.f32.mrb[80].mxu0 }
 0x447   : > { %v2470_v35 = vadd.f32 %v2432_v56, %v2276_v17  ;;  %v3995_v53 = vpop.f32.mrb[81].mxu0 }
 0x448   : > { %v2435_v8 = vpop.f32.mrb[82].mxu0 }
 0x449   : > { %v2486_v1 = vadd.f32 %v5484_v40, %v2470_v35  ;;  %v2471_v58 = vadd.f32 %v2435_v8, %v2279_v51  ;;  %v3996_v38 = vpop.f32.mrb[83].mxu0 }
 0x44a   : > { %v4313_v38 = vld [vmem:[#allocation13 + $0x98] sm:$0xff]  }
 0x44b   : > { %v2551_v3 = vsel %vm2506_vm0, %v2486_v1, 0.0  ;;  %v2487_v61 = vadd.f32 %v5484_v40, %v2471_v58 }
 0x44c   : > { %vm2560_vm15 = vcmp.ge.f32.partialorder %v2551_v3, 0.0  ;;  %v2569_v4 = vmul.f32 0.1, %v2551_v3 }
 0x44d   : > { %vm2561_vm2 = vcmp.ge.f32.partialorder %v2487_v61, 0.0  ;;  %v2570_v11 = vmul.f32 0.1, %v2487_v61 }
 0x44e   : > { %v2578_v6 = vsel %vm2560_vm15, %v2551_v3, %v2569_v4  ;;  %v2440_v45 = vpop.f32.mrb[84].mxu0 }
 0x44f   : > { %v2579_v36 = vsel %vm2561_vm2, %v2487_v61, %v2570_v11  ;;  %v2472_v12 = vadd.f32 %v2440_v45, %v2284_v9  ;;  %v3999_v15 = vpop.f32.mrb[85].mxu0 }
 0x450   : > { %v2443_v17 = vpop.f32.mrb[86].mxu0  ;;  %v2587_v31 = vpack.c.bf16 %v2579_v36, %v2578_v6 }
 0x451   : > { %v2488_v16 = vadd.f32 %v5484_v40, %v2472_v12  ;;  %v2473_v19 = vadd.f32 %v2443_v17, %v2287_v21  ;;  %v4000_v22 = vpop.f32.mrb[87].mxu0 }
 0x452   : > { %4053 = vmatprep.mubr.bf16.mxu1 %v2587_v31  ;;  %v2628_v25 = vshll.u32 %v2587_v31, 16  ;;  %v2626_v42 = vshrl.u32 %v2587_v31, 16  ;;  %v2913_v44 = vrot.slane %v2587_v31, 1  ;;  %v4314_v31 = vld [vmem:[#allocation13 + $0xa0] sm:$0xff]  }
 0x453   : > { %v2571_v51 = vmul.f32 0.1, %v2488_v16  ;;  %v2489_v60 = vadd.f32 %v5484_v40, %v2473_v19  ;;  %vm2562_vm3 = vcmp.ge.f32.partialorder %v2488_v16, 0.0 }
 0x454   : > { %v2630_v18 = vrot.slane %v2628_v25, 1 }
 0x455   : > { %vm2563_vm4 = vcmp.ge.f32.partialorder %v2489_v60, 0.0  ;;  %v2572_v27 = vmul.f32 0.1, %v2489_v60  ;;  %v2580_v28 = vsel %vm2562_vm3, %v2488_v16, %v2571_v51 }
 0x456   : > { %v2448_v13 = vpop.f32.mrb[88].mxu0 }
 0x457   : > { %v2581_v7 = vsel %vm2563_vm4, %v2489_v60, %v2572_v27  ;;  %v2474_v30 = vadd.f32 %v2448_v13, %v2292_v46  ;;  %v4003_v9 = vpop.f32.mrb[89].mxu0  ;;  %v2631_v46 = vor.u32 %v2630_v18, %v2626_v42 }
 0x458   : > { %v2588_v57 = vpack.c.bf16 %v2581_v7, %v2580_v28  ;;  %v2451_v39 = vpop.f32.mrb[90].mxu0  ;;  %v4315_v28 = vld [vmem:[#allocation13 + $0xa8] sm:$0xff]  }
 0x459   : > { %v2490_v21 = vadd.f32 %v5484_v40, %v2474_v30  ;;  %v2475_v47 = vadd.f32 %v2451_v39, %v2295_v10  ;;  %v4004_v23 = vpop.f32.mrb[91].mxu0 }
 0x45a   : > { %4054 = vmatmul.mubr.bf16.vlgmr.msra.gmra.mrb[80].mxu1 %v2588_v57  ;;  %v2633_v43 = vshll.u32 %v2588_v57, 16  ;;  %v2914_v26 = vrot.slane %v2588_v57, 1  ;;  %v2637_v11 = vshrl.u32 %v2588_v57, 16 }
 0x45b   : > { %v2573_v0 = vmul.f32 0.1, %v2490_v21  ;;  %v2491_v50 = vadd.f32 %v5484_v40, %v2475_v47  ;;  %4062 = vmatpush3.bf16.msra.mxu1 %v5471_v20  ;;  %vm2564_vm5 = vcmp.ge.f32.partialorder %v2490_v21, 0.0  ;;  %v4316_v47 = vld [vmem:[#allocation13 + $0xb0] sm:$0xff]  }
 0x45c   : > { %4063 = vmatprep.subr.bf16.mxu1 %v4309_v32  ;;  %v2635_v14 = vrot.slane %v2633_v43, 1  ;;  %v2915_v54 = vsel %vm1029_vm13, %v2913_v44, %v2914_v26  ;;  %v4317_v44 = vld [vmem:[#allocation13 + $0xb8] sm:$0xff]  }
 0x45d   : > { %vm2565_vm7 = vcmp.ge.f32.partialorder %v2491_v50, 0.0  ;;  %v2574_v10 = vmul.f32 0.1, %v2491_v50  ;;  %v2582_v35 = vsel %vm2564_vm5, %v2490_v21, %v2573_v0 }
 0x45e   : > { %v2456_v55 = vpop.f32.mrb[92].mxu0  ;;  %v2636_v56 = vsel %vm720_vm6, %v2631_v46, %v2635_v14  ;;  %v2639_v15 = vor.u32 %v2637_v11, %v2635_v14 }
 0x45f   : > { %v2583_v53 = vsel %vm2565_vm7, %v2491_v50, %v2574_v10  ;;  %v2476_v8 = vadd.f32 %v2456_v55, %v5474_v63  ;;  %4064 = vmatpush3.bf16.msra.mxu1 %v4309_v32  ;;  %v4007_v1 = vpop.f32.mrb[93].mxu0  ;;  %4029 = vmatprep.mubr.bf16.mxu0 %v2636_v56  ;;  %v2505_v63 = vadd.s32 4294967295, %v5248_v24 }
 0x460   : > { %v2459_v20 = vpop.f32.mrb[94].mxu0  ;;  %4065 = vmatprep.subr.bf16.mxu1 %v4311_v34  ;;  %v2589_v58 = vpack.c.bf16 %v2583_v53, %v2582_v35 }
 0x461   : > { %v2492_v3 = vadd.f32 %v5484_v40, %v2476_v8  ;;  %v2477_v61 = vadd.f32 %v2459_v20, %v5476_v49  ;;  %v4008_v4 = vpop.f32.mrb[95].mxu0  ;;  %vm2523_vm10 = vcmp.lt.s32.totalorder %v2505_v63, 64 }
 0x462   : > { %4057 = vmatprep.mubr.bf16.mxu1 %v2589_v58  ;;  %v2641_v6 = vshll.u32 %v2589_v58, 16  ;;  %v2916_v45 = vrot.slane %v2589_v58, 1  ;;  %v2645_v9 = vshrl.u32 %v2589_v58, 16 }
 0x463   : > { %v2575_v36 = vmul.f32 0.1, %v2492_v3  ;;  %v2493_v12 = vadd.f32 %v5484_v40, %v2477_v61  ;;  %4066 = vmatpush3.bf16.msra.mxu1 %v4311_v34  ;;  %vm2566_vm8 = vcmp.ge.f32.partialorder %v2492_v3, 0.0 }
 0x464   : > { %4067 = vmatprep.subr.bf16.mxu1 %v4313_v38  ;;  %v2643_v17 = vrot.slane %v2641_v6, 1  ;;  %v2917_v16 = vsel %vm1029_vm13, %v2914_v26, %v2916_v45 }
 0x465   : > { %vm2567_vm9 = vcmp.ge.f32.partialorder %v2493_v12, 0.0  ;;  %v2576_v49 = vmul.f32 0.1, %v2493_v12  ;;  %v2584_v51 = vsel %vm2566_vm8, %v2492_v3, %v2575_v36 }
 0x466   : > { %v2464_v19 = vpop.f32.mrb[96].mxu0  ;;  %v2644_v22 = vsel %vm720_vm6, %v2639_v15, %v2643_v17  ;;  %v2647_v18 = vor.u32 %v2645_v9, %v2643_v17 }
 0x467   : > { %v2585_v60 = vsel %vm2567_vm9, %v2493_v12, %v2576_v49  ;;  %v2478_v25 = vadd.f32 %v2464_v19, %v5478_v52  ;;  %4068 = vmatpush3.bf16.msra.mxu1 %v4313_v38  ;;  %v4011_v27 = vpop.f32.mrb[97].mxu0  ;;  %4030 = vmatmul.mubr.bf16.vlgmr.msra.gmra.mrb[100].mxu0 %v2644_v22  ;;  %v3491_v38 = vld [vmem:[%s5700_s24] ss:$0 sm:$0xff] }
 0x468   : > { %v2467_v24 = vpop.f32.mrb[98].mxu0  ;;  %4069 = vmatprep.subr.bf16.mxu1 %v4314_v31  ;;  %v2590_v13 = vpack.c.bf16 %v2585_v60, %v2584_v51 }
 0x469   : > { %v2494_v7 = vadd.f32 %v5484_v40, %v2478_v25  ;;  %v4012_v30 = vpop.f32.mrb[99].mxu0 }
 0x46a   : > { %4058 = vmatmul.mubr.bf16.gmra.mrb[84].mxu1 %v2590_v13  ;;  %v2649_v57 = vshll.u32 %v2590_v13, 16  ;;  %v2918_v39 = vrot.slane %v2590_v13, 1  ;;  %v2653_v26 = vshrl.u32 %v2590_v13, 16 }
 0x46b   : > { %v2559_v32 = vsel %vm2523_vm10, %v2494_v7, 0.0  ;;  %4070 = vmatpush3.bf16.msra.mxu1 %v4314_v31  ;;  %4077 = vmatprep.mubr.bf16.mxu1 %v2915_v54 }
 0x46c   : > { %vm2568_vm11 = vcmp.ge.f32.partialorder %v2559_v32, 0.0  ;;  %v2577_v52 = vmul.f32 0.1, %v2559_v32  ;;  %4071 = vmatprep.subr.bf16.mxu1 %v4315_v28  ;;  %v2651_v21 = vrot.slane %v2649_v57, 1  ;;  %v2919_v23 = vsel %vm1029_vm13, %v2916_v45, %v2918_v39 }
 0x46e   : > { %v2586_v42 = vsel %vm2568_vm11, %v2559_v32, %v2577_v52  ;;  %v2652_v43 = vsel %vm720_vm6, %v2647_v18, %v2651_v21  ;;  %v2655_v46 = vor.u32 %v2653_v26, %v2651_v21 }
 0x46f   : > { %v2591_v40 = vpack.c.bf16 %v2586_v42, %v2586_v42  ;;  %4072 = vmatpush3.bf16.msra.mxu1 %v4315_v28  ;;  %4033 = vmatprep.mubr.bf16.mxu0 %v2652_v43 }
 0x470   : > { %4073 = vmatprep.subr.bf16.mxu1 %v4316_v47 }
 0x471   : > { %v2657_v0 = vshll.u32 %v2591_v40, 16  ;;  %v2920_v50 = vrot.slane %v2591_v40, 1 }
 0x473   : > { %4074 = vmatpush3.bf16.msra.mxu1 %v4316_v47  ;;  %v2659_v14 = vrot.slane %v2657_v0, 1  ;;  %v2921_v34 = vsel %vm1029_vm13, %v2918_v39, %v2920_v50  ;;  %vm3133_vm13 = vcmask 1045508  }
 0x474   : > { %4075 = vmatprep.subr.bf16.mxu1 %v4317_v44  ;;  %vm5519_vm14 = vmor %vm1817_vm12, %vm3133_vm13 }
 0x475   : > { %v2660_v54 = vsel %vm720_vm6, %v2655_v46, %v2659_v14  ;;  %vm3070_vm6 = vcmask 1043456  }
 0x476   : > { %4034 = vmatmul.mubr.bf16.gmra.mrb[104].mxu0 %v2660_v54 }
 0x477   : > { %4076 = vmatpush3.bf16.msra.mxu1 %v4317_v44 }
 0x47a   : > { %4078 = vmatmul.mubr.bf16.vlgmr.msra.gmra.mrb[80].mxu1 %v2917_v16 }
 0x47b   : > { %4081 = vmatprep.mubr.bf16.mxu1 %v2919_v23 }
 0x482   : > { %4082 = vmatmul.mubr.bf16.gmra.mrb[84].mxu1 %v2921_v34 }
 0x53a   : > { %v4031_v10 = vpop.f32.mrb[100].mxu0 }
 0x53b   : > { %v2747_v55 = vpop.f32.mrb[101].mxu0 }
 0x53c   : > { %v4032_v56 = vpop.f32.mrb[102].mxu0 }
 0x53d   : > { %v2750_v35 = vpop.f32.mrb[103].mxu0 }
 0x549   : > { %v4035_v53 = vpop.f32.mrb[104].mxu0 }
 0x54a   : > { %v2763_v8 = vpop.f32.mrb[105].mxu0 }
 0x54b   : > { %v4036_v1 = vpop.f32.mrb[106].mxu0 }
 0x54c   : > { %v2766_v20 = vpop.f32.mrb[107].mxu0 }
 0x54d   : > { %v4079_v58 = vpop.f32.mrb[80].mxu1 }
 0x54e   : > { %v4085_v3 = vadd.f32 %v4079_v58, %v4031_v10  ;;  %v3008_v61 = vpop.f32.mrb[81].mxu1 }
 0x54f   : > { %v4086_v4 = vadd.f32 %v3008_v61, %v2747_v55  ;;  %v4080_v11 = vpop.f32.mrb[82].mxu1 }
 0x550   : > { %v3056_v6 = vadd.f32 %v4085_v3, %v3491_v38  ;;  %v4087_v45 = vadd.f32 %v4080_v11, %v4032_v56  ;;  %v3011_v36 = vpop.f32.mrb[83].mxu1 }
 0x551   : > { %v3054_v12 = vadd.f32 %v4086_v4, %v3491_v38  ;;  %v4088_v63 = vadd.f32 %v3011_v36, %v2750_v35 }
 0x552   : > { %v3057_v15 = vadd.f32 %v4087_v45, %v3491_v38  ;;  %v3074_v16 = vrot.slane %v3056_v6, 4 }
 0x553   : > { %v3071_v17 = vrot.slane %v3054_v12, 4  ;;  %v3055_v31 = vadd.f32 %v4088_v63, %v3491_v38 }
 0x554   : > { %v3076_v49 = vrot.slane %v3057_v15, 4 }
 0x555   : > { %v3095_v19 = vadd.f32 %v3071_v17, %v5337_v5  ;;  %v3072_v22 = vrot.slane %v3055_v31, 4  ;;  %v4083_v51 = vpop.f32.mrb[84].mxu1 }
 0x556   : > { %v3077_v60 = vsel %vm3070_vm6, %v3074_v16, %v3076_v49  ;;  %v4089_v25 = vadd.f32 %v4083_v51, %v4035_v53  ;;  %v3024_v27 = vpop.f32.mrb[85].mxu1 }
 0x557   : > { %v3098_v24 = vadd.f32 %v3077_v60, %v5371_v62  ;;  %v3073_v13 = vsel %vm3070_vm6, %v3071_v17, %v3072_v22  ;;  %v3075_v28 = vsel %vm3070_vm6, %v3072_v22, %v3074_v16  ;;  %v4084_v7 = vpop.f32.mrb[86].mxu1  ;;  %v3508_v30 = vpack.c.bf16 %v3095_v19, %v3095_v19 }
 0x558   : > { %v3096_v9 = vadd.f32 %v3073_v13, %v5345_v37  ;;  %v3097_v57 = vadd.f32 %v3075_v28, %v5352_v41  ;;  %v4090_v5 = vadd.f32 %v3024_v27, %v2763_v8  ;;  %v3027_v39 = vpop.f32.mrb[87].mxu1  ;;  %v3060_v18 = vadd.f32 %v4089_v25, %v3491_v38 }
 0x559   : > { %v3511_v32 = vpack.c.bf16 %v3098_v24, %v3098_v24  ;;  %v4091_v52 = vadd.f32 %v4084_v7, %v4036_v1  ;;  %v4092_v21 = vadd.f32 %v3027_v39, %v2766_v20  ;;  %v3501_v37 = vrot.slane %v3508_v30, 10 }
 0x55a   : > { %v3509_v47 = vpack.c.bf16 %v3096_v9, %v3096_v9  ;;  %v3510_v23 = vpack.c.bf16 %v3097_v57, %v3097_v57  ;;  %v3058_v62 = vadd.f32 %v4090_v5, %v3491_v38  ;;  %v3082_v50 = vrot.slane %v3060_v18, 4 }
 0x55b   : > { %v3061_v43 = vadd.f32 %v4091_v52, %v3491_v38  ;;  %v3059_v40 = vadd.f32 %v4092_v21, %v3491_v38  ;;  %v3143_v0 = vrot.slane %v3511_v32, 6 }
 0x55c   : > { %v3137_v44 = vrot.slane %v3509_v47, 6  ;;  %v3140_v41 = vrot.slane %v3510_v23, 6  ;;  %v3078_v26 = vrot.slane %v3058_v62, 4 }
 0x55d   : > { %v3084_v46 = vrot.slane %v3061_v43, 4  ;;  %v3080_v14 = vrot.slane %v3059_v40, 4  ;;  %v3145_v11 = vrot.slane %v3143_v0, 4 }
 0x55e   : > { %v3138_v34 = vsel %vm5519_vm14, %v3501_v37, %v3137_v44  ;;  %v3139_v54 = vrot.slane %v3137_v44, 4  ;;  %v3142_v10 = vrot.slane %v3140_v41, 4  ;;  %v3079_v55 = vsel %vm3070_vm6, %v3076_v49, %v3078_v26 }
 0x55f   : > { %3168 = vst [vmem:[%s5528_s28] sm:$0xf] %v3138_v34  ;;  %v3099_v56 = vadd.f32 %v3079_v55, %v5379_v2  ;;  %v3085_v35 = vsel %vm3070_vm6, %v3082_v50, %v3084_v46  ;;  %v3103_v53 = vadd.f32 %v3084_v46, %v5432_v48  ;;  %v3081_v8 = vsel %vm3070_vm6, %v3078_v26, %v3080_v14 }
 0x560   : > { %v3141_v1 = vsel %vm5519_vm14, %v3139_v54, %v3140_v41  ;;  %v3144_v20 = vsel %vm5519_vm14, %v3142_v10, %v3143_v0  ;;  %v3102_v58 = vadd.f32 %v3085_v35, %v5429_v59  ;;  %v3083_v38 = vsel %vm3070_vm6, %v3080_v14, %v3082_v50 }
 0x561   : > { %3169 = vst [vmem:[%s5528_s28 + $0x4] sm:$0xf] %v3141_v1  ;;  %3170 = vst [vmem:[%s5528_s28 + $0x8] sm:$0xf] %v3144_v20  ;;  %v3512_v2 = vpack.c.bf16 %v3099_v56, %v3099_v56  ;;  %v3100_v48 = vadd.f32 %v3081_v8, %v5399_v29  ;;  %v3101_v3 = vadd.f32 %v3083_v38, %v5405_v33 }
 0x562   : > { %v3515_v61 = vpack.c.bf16 %v3102_v58, %v3102_v58  ;;  %v3516_v4 = vpack.c.bf16 %v3103_v53, %v3103_v53 }
 0x563   : > { %v3146_v6 = vrot.slane %v3512_v2, 6  ;;  %v3513_v45 = vpack.c.bf16 %v3100_v48, %v3100_v48  ;;  %v3514_v36 = vpack.c.bf16 %v3101_v3, %v3101_v3 }
 0x564   : > { %v3155_v12 = vrot.slane %v3515_v61, 6  ;;  %v3158_v17 = vrot.slane %v3516_v4, 6 }
 0x565   : > { %v3147_v29 = vsel %vm5519_vm14, %v3145_v11, %v3146_v6  ;;  %v3148_v33 = vrot.slane %v3146_v6, 4  ;;  %v3149_v59 = vrot.slane %v3513_v45, 6  ;;  %v3152_v63 = vrot.slane %v3514_v36, 6 }
 0x566   : > { %3171 = vst [vmem:[%s5528_s28 + $0xc] sm:$0xf] %v3147_v29  ;;  %v3157_v15 = vrot.slane %v3155_v12, 4 }
 0x567   : > { %v3150_v31 = vsel %vm5519_vm14, %v3148_v33, %v3149_v59  ;;  %v3151_v16 = vrot.slane %v3149_v59, 4  ;;  %v3154_v49 = vrot.slane %v3152_v63, 4 }
 0x568   : > { %v3159_v19 = vsel %vm5519_vm14, %v3157_v15, %v3158_v17  ;;  %3172 = vst [vmem:[%s5528_s28 + $0x10] sm:$0xf] %v3150_v31 }
 0x569   : > { %3175 = vst [vmem:[%s5528_s28 + $0x1c] sm:$0xf] %v3159_v19  ;;  %v3153_v22 = vsel %vm5519_vm14, %v3151_v16, %v3152_v63  ;;  %v3156_v51 = vsel %vm5519_vm14, %v3154_v49, %v3155_v12 }
 0x56a   : > { %3173 = vst [vmem:[%s5528_s28 + $0x14] sm:$0xf] %v3153_v22  ;;  %3174 = vst [vmem:[%s5528_s28 + $0x18] sm:$0xf] %v3156_v51 }
 0x56b   : > { %4535 = shalt.err (!%p4532_p9)
}
 0x56c   : > { %s4550_s30 = scalar_lea.hbm %s5549_s13, 1024  ;;  %s4540_s10 = scalar_lea.hbm %s5705_s3, 3072 }
 0x56d   : > { %p4537_p3 = scmp.ne.s32.totalorder %s5558_s12, %s4550_s30  ;;  %p4541_p2 = scmp.lt.u32.totalorder %s5558_s12, %s5705_s3 }
 0x56e   : > { %p4542_p10 = scmp.lt.u32.totalorder %s4540_s10, %s4550_s30  ;;  %p4544_p7 = scmp.lt.u32.totalorder %s4550_s30, %s5558_s12 }
 0x56f   : > { %p4538_p8 = pnand %p4537_p3, %p5707_p6 }
 0x570   : > { %p4543_p5 = por %p4542_p10, %p4541_p2 }
 0x571   : > { %p4539_p11 = pneg %p4538_p8 }
 0x572   : > { %p4545_p4 = por %p4544_p7, %p4543_p5 }
 0x574   : > { %p4546_p1 = pnand %p4545_p4, %p4539_p11 }
 0x576   : > { %4549 = shalt.err (!%p4546_p1)
}
 0x577   : > { %s4631_s14 = smov 64   ;;  %s4632_s24 = smov 4  }
 0x578   : > { %4124 = dma.vmem_to_hbm [thread:$0]  (%p5707_p6), %s5560_s27, 512, %s5558_s12, %s3177_s6, %s4631_s14, %s4631_s14, %s4632_s24  }
 0x579 PF: > { %s5708_s22 = sld [smem:[#allocation20_spill]]  ;;  %s5709_s28 = sld [smem:[#allocation25_spill]] }
 0x57a   : > { %s5710_s26 = sld [smem:[#allocation24_spill]] }
 0x57f   : > { %s3208_s16 = sand.u32 1, %s5708_s22   ;;  %p5711_p13 = scmp.ne.s32.totalorder %s5709_s28, 0 }
 0x580   : > { %p5712_p12 = scmp.ge.s32.totalorder %s5710_s26, 2  ;;  %s3209_s1 = scalar_lea.sflag [#allocation4], %s3208_s16 }
 0x582   : > { %p4150_p0 = pnand %p5712_p12, %p5711_p13 }
 0x584   : > { %4592 = dma.done.wait (!%p4150_p0), %s3209_s1, 512  }
 0x585   : > { %4594 = vsyncadd (!%p4150_p0), %s3209_s1, 4294966784  ;;  %s32_s22 = sadd.s32 1, %s5710_s26   ;;  %s5713_s21 = sld [smem:[#allocation21_spill]] }
 0x586   : > { %p29_p9 = scmp.ge.s32.totalorder %s32_s22, 4   ;;  %s5714_s19 = sld [smem:[#allocation28_spill]] }
 0x587   : > { %s5715_s20 = sld [smem:[#allocation23_spill]]  ;;  %s5716_s13 = sld [smem:[#allocation26_spill]] }
 0x588   : > { %s5717_s17 = smov %s4601_s18  ;;  %31 = sbr.rel (!%p29_p9) target bundleno = 18 (0x12), region = 157 }
 0x58b   : > { %s5718_s18 = smov %s5713_s21 }
 0x58d   : > { %s5719_s21 = smov %s5716_s13 }
 0x58f   :  { %3214 = vsyncpa [#allocation3], 1 }
 0x590   :  { %3216 = vsyncpa [#allocation3 + $0x1], 1 }
 0x591   :  { %3217 = vsyncpa [#allocation6], 1 }
 0x592   :  { %3219 = vsyncpa [#allocation6 + $0x1], 1 }
 0x593   :  { %3220 = vsyncpa [#allocation9], 1 }
 0x594   :  { %3221 = vsyncpa [#allocation12], 1 }
 0x595   :  { %3222 = vsyncpa [#allocation4], 1 }
 0x596   :  { %3224 = vsyncpa [#allocation4 + $0x1], 1 }

</bundles_post_ra>
